<compile_context>
chip_gen: v7x
topology: tpu7x:2x2x1
jax: 0.10.0
libtpu: 0.0.40
codegen_flags: <defaults>
</compile_context>

<pallas_src>
import functools

import jax
import jax.numpy as jnp
from jax.experimental import pallas as pl
from jax.experimental.pallas import tpu as pltpu

LANE = 128          # TPU lane width; hidden dim padded to this.
OUT_SUB = 8         # logit rows padded up to a sublane group.
NEG_BIG = -1e30     # bias for padded logit rows (exp -> 0); f32-safe.


def _round_up(x, m):
    return ((x + m - 1) // m) * m


def pgnn_kernel(x_ref, w1_ref, b1_ref, w2_ref, b2_ref, w3_ref, b3_ref, o_ref):
    # Feature-major tiles: x (in_dim, tb); weights stored (out_features, in_features).
    xt = x_ref[...]                      # (in_dim, tb) f32
    in_dim = xt.shape[0]

    # ---- Layer 1: Linear(in_dim, 24) + ReLU as a VPU broadcast-FMA ----------
    # K = in_dim (= 4) is too small for a useful MXU pass and can force an
    # x relayout through the XLU; do 4 broadcast multiply-adds on the VPU.
    w1 = w1_ref[...]                     # (128, in_dim) f32
    h1 = b1_ref[...] + w1[:, 0:1] * xt[0:1, :]
    for k in range(1, in_dim):
        h1 = h1 + w1[:, k:k + 1] * xt[k:k + 1, :]
    h1 = jnp.maximum(h1, 0.0)            # (128, tb) f32; padded rows stay 0

    # ---- Layer 2: Linear(24, 24) + ReLU on the MXU (bf16 in, f32 acc) -------
    h2 = jnp.dot(w2_ref[...], h1.astype(jnp.bfloat16),
                 preferred_element_type=jnp.float32) + b2_ref[...]
    h2 = jnp.maximum(h2, 0.0)            # (128, tb) f32

    # ---- Layer 3: Linear(24, output_dim) -------------------------------------
    # Rows >= output_dim carry a -1e30 bias -> exp() == 0 below.
    logits = jnp.dot(w3_ref[...], h2.astype(jnp.bfloat16),
                     preferred_element_type=jnp.float32) + b3_ref[...]   # (8, tb)

    # ---- Softmax over the action axis (sublanes) ------------------------------
    m = jnp.max(logits, axis=0, keepdims=True)           # (1, tb)
    e = jnp.exp(logits - m)                              # (8, tb)
    s = jnp.sum(e, axis=0, keepdims=True)                # (1, tb), >= 1
    inv = pl.reciprocal(s, approx=True)                  # EUP slot (nearly free)
    inv = inv * (2.0 - s * inv)                          # Newton step -> f32 exact
    probs = e * inv                                      # (8, tb)

    # Lane-dense store of only the real action rows: (output_dim, tb) f32.
    o_ref[...] = probs[:o_ref.shape[0], :]


def pgnn_forward(x, padded_params, output_dim, *, block_batch=2048):
    """x: (batch, input_dim) f32.  Returns (batch, output_dim) softmax probs."""
    w1t, b1t, w2t, b2t, w3t, b3t = padded_params
    batch, in_dim = x.shape

    # Feature-major activations: batch on the 128-lane axis (tiny transpose of
    # a (batch, 4) array; a real rollout loop could keep states this way).
    xt = x.T                                             # (in_dim, batch)

    # Tile selection: multiple of 128 lanes, capped at block_batch, and >= 2
    # grid steps whenever the batch spans more than one lane tile so the
    # "parallel" grid axis can shard across v7x's two TensorCores.
    b128 = _round_up(batch, 128)
    if b128 > 128:
        tb = min(block_batch, _round_up(-(-b128 // 2), 128))
    else:
        tb = 128
    tb = max(tb, 128)
    b_pad = _round_up(b128, tb)
    if b_pad != batch:
        xt = jnp.pad(xt, ((0, 0), (0, b_pad - batch)))   # a few KB; negligible

    grid = (b_pad // tb,)
    resident = lambda i: (0, 0)    # weights/biases: never re-DMA'd across steps

    out_t = pl.pallas_call(
        pgnn_kernel,
        out_shape=jax.ShapeDtypeStruct((output_dim, b_pad), jnp.float32),
        grid=grid,
        in_specs=[
            pl.BlockSpec((in_dim, tb), lambda i: (0, i)),   # x^T, tiled on batch
            pl.BlockSpec(w1t.shape, resident),              # W1^T (f32, VPU FMA)
            pl.BlockSpec(b1t.shape, resident),              # b1
            pl.BlockSpec(w2t.shape, resident),              # W2^T (bf16, MXU)
            pl.BlockSpec(b2t.shape, resident),              # b2
            pl.BlockSpec(w3t.shape, resident),              # W3^T (bf16, MXU)
            pl.BlockSpec(b3t.shape, resident),              # b3 (+NEG_BIG pad)
        ],
        out_specs=pl.BlockSpec((output_dim, tb), lambda i: (0, i)),
        compiler_params=pltpu.CompilerParams(
            dimension_semantics=("parallel",),              # v7x: 2 TensorCores
        ),
    )(xt, w1t, b1t, w2t, b2t, w3t, b3t)

    # Back to the PyTorch (batch, output_dim) convention; drops padded columns.
    return out_t[:, :batch].T


# ---------------------------------------------------------------------------
# Parameter construction (matches PyTorch inits), plus padding / transposition.
# ---------------------------------------------------------------------------

def kaiming_uniform(key, fan_in, fan_out):
    # nn.init.kaiming_uniform_(weight) with default a=0: bound = sqrt(6/fan_in).
    # PyTorch weight is (out, in); we store the math layout (in, out) here.
    bound = jnp.sqrt(6.0 / fan_in)
    w_pt = jax.random.uniform(key, (fan_out, fan_in), jnp.float32, -bound, bound)
    return w_pt.T


def default_bias(key, fan_in, fan_out):
    # PyTorch Linear default bias init: U(-1/sqrt(fan_in), 1/sqrt(fan_in)).
    bound = 1.0 / jnp.sqrt(float(fan_in))
    return jax.random.uniform(key, (1, fan_out), jnp.float32, -bound, bound)


def init_params(key, input_dim, output_dim, hidden=24):
    k = jax.random.split(key, 6)
    w1 = kaiming_uniform(k[0], input_dim, hidden)
    b1 = default_bias(k[1], input_dim, hidden)
    w2 = kaiming_uniform(k[2], hidden, hidden)
    b2 = default_bias(k[3], hidden, hidden)
    w3 = kaiming_uniform(k[4], hidden, output_dim)
    b3 = default_bias(k[5], hidden, output_dim)
    return (w1, b1, w2, b2, w3, b3)


def pad_params(params, lane=LANE):
    """Transpose to feature-major, pad hidden to 128, cast MXU weights to bf16."""
    w1, b1, w2, b2, w3, b3 = params
    in_dim, hidden = w1.shape
    out_dim = w3.shape[1]
    hp = lane - hidden
    out_sub = _round_up(out_dim, OUT_SUB)
    op = out_sub - out_dim

    w1t = jnp.pad(w1.T, ((0, hp), (0, 0)))                          # (128, in)  f32
    b1t = jnp.pad(b1.T, ((0, hp), (0, 0)))                          # (128, 1)   f32
    w2t = jnp.pad(w2.T, ((0, hp), (0, hp))).astype(jnp.bfloat16)    # (128, 128) bf16
    b2t = jnp.pad(b2.T, ((0, hp), (0, 0)))                          # (128, 1)   f32
    w3t = jnp.pad(w3.T, ((0, op), (0, hp))).astype(jnp.bfloat16)    # (8, 128)   bf16
    b3t = jnp.pad(b3.T, ((0, op), (0, 0)), constant_values=NEG_BIG) # (8, 1)     f32
    return (w1t, b1t, w2t, b2t, w3t, b3t)


# ---------------------------------------------------------------------------
# References.
# ---------------------------------------------------------------------------

def pgnn_reference(x, params):
    """Pure-f32 reference (original PyTorch forward semantics)."""
    w1, b1, w2, b2, w3, b3 = params
    hi = jax.lax.Precision.HIGHEST
    h1 = jnp.maximum(jnp.dot(x, w1, precision=hi) + b1, 0.0)
    h2 = jnp.maximum(jnp.dot(h1, w2, precision=hi) + b2, 0.0)
    return jax.nn.softmax(jnp.dot(h2, w3, precision=hi) + b3, axis=1)


def pgnn_reference_mxu(x, params):
    """Reference applying the same bf16 MXU-operand rounding the kernel uses."""
    w1, b1, w2, b2, w3, b3 = params
    bf = jnp.bfloat16
    hi = jax.lax.Precision.HIGHEST
    h1 = jnp.maximum(jnp.dot(x, w1, precision=hi) + b1, 0.0)
    h2 = jnp.maximum(
        jnp.dot(h1.astype(bf), w2.astype(bf),
                preferred_element_type=jnp.float32) + b2, 0.0)
    logits = jnp.dot(h2.astype(bf), w3.astype(bf),
                     preferred_element_type=jnp.float32) + b3
    return jax.nn.softmax(logits, axis=1)


if __name__ == "__main__":
    # CartPole: observation dim = 4, action dim = 2.  Batch intentionally not a
    # multiple of the tile (exercises padding) and large enough that the grid
    # has >= 2 steps (v7x megacore path): batch=300 -> tile=256, grid=(2,).
    batch, input_dim, output_dim = 300, 4, 2

    key = jax.random.PRNGKey(0)
    pkey, xkey = jax.random.split(key)
    params = init_params(pkey, input_dim, output_dim)
    padded_params = pad_params(params)
    x = jax.random.normal(xkey, (batch, input_dim), jnp.float32)

    fwd = functools.partial(pgnn_forward, output_dim=output_dim)
    out = jax.block_until_ready(fwd(x, padded_params))

    assert out.shape == (batch, output_dim)
    # Tight check vs a reference with the same bf16 MXU-operand rounding.
    ref_mxu = pgnn_reference_mxu(x, params)
    assert jnp.allclose(out, ref_mxu, atol=1e-4, rtol=1e-4), \
        float(jnp.max(jnp.abs(out - ref_mxu)))
    # Loose check vs the pure-f32 PyTorch-equivalent forward (bf16 MXU rounding).
    ref_f32 = pgnn_reference(x, params)
    assert jnp.allclose(out, ref_f32, atol=3e-2), \
        float(jnp.max(jnp.abs(out - ref_f32)))
    # Rows are valid probability distributions.
    assert jnp.allclose(jnp.sum(out, axis=1), 1.0, atol=1e-5)

    print("KERNEL_OK")
</pallas_src>

<mosaic_0001>
module attributes {stable_mosaic.version = 11 : i64} {
  func.func @pgnn_kernel(%arg0: i32, %arg1: memref<4x256xf32, #tpu.memory_space<vmem>>, %arg2: memref<128x4xf32, #tpu.memory_space<vmem>>, %arg3: memref<128x1xf32, #tpu.memory_space<vmem>>, %arg4: memref<128x128xbf16, #tpu.memory_space<vmem>>, %arg5: memref<128x1xf32, #tpu.memory_space<vmem>>, %arg6: memref<8x128xbf16, #tpu.memory_space<vmem>>, %arg7: memref<8x1xf32, #tpu.memory_space<vmem>>, %arg8: memref<2x256xf32, #tpu.memory_space<vmem>>) attributes {dimension_semantics = [#tpu.dimension_semantics<parallel>], iteration_bounds = array<i64: 2>, scalar_prefetch = 0 : i64, scratch_operands = 0 : i64, tpu.core_type = #tpu.core_type<tc>, window_params = [{transform_indices = @transform_0, window_bounds = array<i64: 4, 256>}, {pipeline_mode = #tpu.pipeline_mode<synchronous>, transform_indices = @transform_1, window_bounds = array<i64: 128, 4>}, {pipeline_mode = #tpu.pipeline_mode<synchronous>, transform_indices = @transform_2, window_bounds = array<i64: 128, 1>}, {pipeline_mode = #tpu.pipeline_mode<synchronous>, transform_indices = @transform_3, window_bounds = array<i64: 128, 128>}, {pipeline_mode = #tpu.pipeline_mode<synchronous>, transform_indices = @transform_4, window_bounds = array<i64: 128, 1>}, {pipeline_mode = #tpu.pipeline_mode<synchronous>, transform_indices = @transform_5, window_bounds = array<i64: 8, 128>}, {pipeline_mode = #tpu.pipeline_mode<synchronous>, transform_indices = @transform_6, window_bounds = array<i64: 8, 1>}, {transform_indices = @transform_7, window_bounds = array<i64: 2, 256>}]} {
    %c0 = arith.constant 0 : index
    %c0_0 = arith.constant 0 : index
    %0 = vector.load %arg1[%c0, %c0_0] : memref<4x256xf32, #tpu.memory_space<vmem>>, vector<4x256xf32>
    %c0_1 = arith.constant 0 : index
    %c0_2 = arith.constant 0 : index
    %1 = vector.load %arg2[%c0_1, %c0_2] : memref<128x4xf32, #tpu.memory_space<vmem>>, vector<128x4xf32>
    %c0_3 = arith.constant 0 : index
    %c0_4 = arith.constant 0 : index
    %2 = vector.load %arg3[%c0_3, %c0_4] : memref<128x1xf32, #tpu.memory_space<vmem>>, vector<128x1xf32>
    %3 = vector.extract_strided_slice %1 {offsets = [0, 0], sizes = [128, 1], strides = [1, 1]} : vector<128x4xf32> to vector<128x1xf32>
    %4 = vector.extract_strided_slice %0 {offsets = [0, 0], sizes = [1, 256], strides = [1, 1]} : vector<4x256xf32> to vector<1x256xf32>
    %5 = vector.broadcast %3 : vector<128x1xf32> to vector<128x256xf32>
    %6 = vector.broadcast %4 : vector<1x256xf32> to vector<128x256xf32>
    %7 = arith.mulf %5, %6 : vector<128x256xf32>
    %8 = vector.broadcast %2 : vector<128x1xf32> to vector<128x256xf32>
    %9 = arith.addf %8, %7 : vector<128x256xf32>
    %10 = vector.extract_strided_slice %1 {offsets = [0, 1], sizes = [128, 1], strides = [1, 1]} : vector<128x4xf32> to vector<128x1xf32>
    %11 = vector.extract_strided_slice %0 {offsets = [1, 0], sizes = [1, 256], strides = [1, 1]} : vector<4x256xf32> to vector<1x256xf32>
    %12 = vector.broadcast %10 : vector<128x1xf32> to vector<128x256xf32>
    %13 = vector.broadcast %11 : vector<1x256xf32> to vector<128x256xf32>
    %14 = arith.mulf %12, %13 : vector<128x256xf32>
    %15 = arith.addf %9, %14 : vector<128x256xf32>
    %16 = vector.extract_strided_slice %1 {offsets = [0, 2], sizes = [128, 1], strides = [1, 1]} : vector<128x4xf32> to vector<128x1xf32>
    %17 = vector.extract_strided_slice %0 {offsets = [2, 0], sizes = [1, 256], strides = [1, 1]} : vector<4x256xf32> to vector<1x256xf32>
    %18 = vector.broadcast %16 : vector<128x1xf32> to vector<128x256xf32>
    %19 = vector.broadcast %17 : vector<1x256xf32> to vector<128x256xf32>
    %20 = arith.mulf %18, %19 : vector<128x256xf32>
    %21 = arith.addf %15, %20 : vector<128x256xf32>
    %22 = vector.extract_strided_slice %1 {offsets = [0, 3], sizes = [128, 1], strides = [1, 1]} : vector<128x4xf32> to vector<128x1xf32>
    %23 = vector.extract_strided_slice %0 {offsets = [3, 0], sizes = [1, 256], strides = [1, 1]} : vector<4x256xf32> to vector<1x256xf32>
    %24 = vector.broadcast %22 : vector<128x1xf32> to vector<128x256xf32>
    %25 = vector.broadcast %23 : vector<1x256xf32> to vector<128x256xf32>
    %26 = arith.mulf %24, %25 : vector<128x256xf32>
    %27 = arith.addf %21, %26 : vector<128x256xf32>
    %cst = arith.constant 0.000000e+00 : f32
    %28 = vector.broadcast %cst : f32 to vector<128x256xf32>
    %29 = arith.maximumf %27, %28 : vector<128x256xf32>
    %c0_5 = arith.constant 0 : index
    %c0_6 = arith.constant 0 : index
    %30 = vector.load %arg4[%c0_5, %c0_6] : memref<128x128xbf16, #tpu.memory_space<vmem>>, vector<128x128xbf16>
    %31 = arith.truncf %29 : vector<128x256xf32> to vector<128x256xbf16>
    %cst_7 = arith.constant dense<0.000000e+00> : vector<128x256xf32>
    %32 = tpu.matmul %30, %31, %cst_7 {dimension_numbers = #tpu.dot_dimension_numbers<[1], [0], [0], [1], [0, 0, 1, 1], [], []>} : vector<128x128xbf16>, vector<128x256xbf16>, vector<128x256xf32> -> vector<128x256xf32>
    %c0_8 = arith.constant 0 : index
    %c0_9 = arith.constant 0 : index
    %33 = vector.load %arg5[%c0_8, %c0_9] : memref<128x1xf32, #tpu.memory_space<vmem>>, vector<128x1xf32>
    %34 = vector.broadcast %33 : vector<128x1xf32> to vector<128x256xf32>
    %35 = arith.addf %32, %34 : vector<128x256xf32>
    %cst_10 = arith.constant 0.000000e+00 : f32
    %36 = vector.broadcast %cst_10 : f32 to vector<128x256xf32>
    %37 = arith.maximumf %35, %36 : vector<128x256xf32>
    %c0_11 = arith.constant 0 : index
    %c0_12 = arith.constant 0 : index
    %38 = vector.load %arg6[%c0_11, %c0_12] : memref<8x128xbf16, #tpu.memory_space<vmem>>, vector<8x128xbf16>
    %39 = arith.truncf %37 : vector<128x256xf32> to vector<128x256xbf16>
    %cst_13 = arith.constant dense<0.000000e+00> : vector<8x256xf32>
    %40 = tpu.matmul %38, %39, %cst_13 {dimension_numbers = #tpu.dot_dimension_numbers<[1], [0], [0], [1], [0, 0, 1, 1], [], []>} : vector<8x128xbf16>, vector<128x256xbf16>, vector<8x256xf32> -> vector<8x256xf32>
    %c0_14 = arith.constant 0 : index
    %c0_15 = arith.constant 0 : index
    %41 = vector.load %arg7[%c0_14, %c0_15] : memref<8x1xf32, #tpu.memory_space<vmem>>, vector<8x1xf32>
    %42 = vector.broadcast %41 : vector<8x1xf32> to vector<8x256xf32>
    %43 = arith.addf %40, %42 : vector<8x256xf32>
    %cst_16 = arith.constant dense<0xFF800000> : vector<256xf32>
    %44 = vector.multi_reduction <maximumf>, %43, %cst_16 [0] : vector<8x256xf32> to vector<256xf32>
    %45 = vector.shape_cast %44 : vector<256xf32> to vector<1x256xf32>
    %46 = vector.broadcast %45 : vector<1x256xf32> to vector<8x256xf32>
    %47 = arith.subf %43, %46 : vector<8x256xf32>
    %48 = math.exp %47 : vector<8x256xf32>
    %cst_17 = arith.constant dense<0.000000e+00> : vector<256xf32>
    %49 = vector.multi_reduction <add>, %48, %cst_17 [0] : vector<8x256xf32> to vector<256xf32>
    %50 = vector.shape_cast %49 : vector<256xf32> to vector<1x256xf32>
    %51 = tpu.reciprocal %50 {approx = true} : vector<1x256xf32> -> vector<1x256xf32>
    %52 = arith.mulf %50, %51 : vector<1x256xf32>
    %cst_18 = arith.constant 2.000000e+00 : f32
    %53 = vector.broadcast %cst_18 : f32 to vector<1x256xf32>
    %54 = arith.subf %53, %52 : vector<1x256xf32>
    %55 = arith.mulf %51, %54 : vector<1x256xf32>
    %56 = vector.broadcast %55 : vector<1x256xf32> to vector<8x256xf32>
    %57 = arith.mulf %48, %56 : vector<8x256xf32>
    %58 = vector.extract_strided_slice %57 {offsets = [0, 0], sizes = [2, 256], strides = [1, 1]} : vector<8x256xf32> to vector<2x256xf32>
    %c0_19 = arith.constant 0 : index
    %c0_20 = arith.constant 0 : index
    %59 = vector.load %arg8[%c0_19, %c0_20] : memref<2x256xf32, #tpu.memory_space<vmem>>, vector<2x256xf32>
    tpu.vector_store %arg8[%c0_19, %c0_20], %58 {strides = array<i32>} : memref<2x256xf32, #tpu.memory_space<vmem>>, vector<2x256xf32>,
    return
  }
  func.func @transform_0(%arg0: i32) -> (i32, i32) {
    %c0_i32 = arith.constant 0 : i32
    %c0_i32_0 = arith.constant 0 : i32
    return %c0_i32, %arg0 : i32, i32
  }
  func.func @transform_1(%arg0: i32) -> (i32, i32) {
    %c0_i32 = arith.constant 0 : i32
    %c0_i32_0 = arith.constant 0 : i32
    %c0_i32_1 = arith.constant 0 : i32
    return %c0_i32, %c0_i32_0 : i32, i32
  }
  func.func @transform_2(%arg0: i32) -> (i32, i32) {
    %c0_i32 = arith.constant 0 : i32
    %c0_i32_0 = arith.constant 0 : i32
    %c0_i32_1 = arith.constant 0 : i32
    return %c0_i32, %c0_i32_0 : i32, i32
  }
  func.func @transform_3(%arg0: i32) -> (i32, i32) {
    %c0_i32 = arith.constant 0 : i32
    %c0_i32_0 = arith.constant 0 : i32
    %c0_i32_1 = arith.constant 0 : i32
    return %c0_i32, %c0_i32_0 : i32, i32
  }
  func.func @transform_4(%arg0: i32) -> (i32, i32) {
    %c0_i32 = arith.constant 0 : i32
    %c0_i32_0 = arith.constant 0 : i32
    %c0_i32_1 = arith.constant 0 : i32
    return %c0_i32, %c0_i32_0 : i32, i32
  }
  func.func @transform_5(%arg0: i32) -> (i32, i32) {
    %c0_i32 = arith.constant 0 : i32
    %c0_i32_0 = arith.constant 0 : i32
    %c0_i32_1 = arith.constant 0 : i32
    return %c0_i32, %c0_i32_0 : i32, i32
  }
  func.func @transform_6(%arg0: i32) -> (i32, i32) {
    %c0_i32 = arith.constant 0 : i32
    %c0_i32_0 = arith.constant 0 : i32
    %c0_i32_1 = arith.constant 0 : i32
    return %c0_i32, %c0_i32_0 : i32, i32
  }
  func.func @transform_7(%arg0: i32) -> (i32, i32) {
    %c0_i32 = arith.constant 0 : i32
    %c0_i32_0 = arith.constant 0 : i32
    return %c0_i32, %arg0 : i32, i32
  }
}

</mosaic_0001>

<bundles_post_ra>
// kernel: tpu_custom_call.1
= control target key start
LH: loop header
LB: loop body
LE: loop exit
PB: predicated region body
PF: predicated region fallthrough
CT: control target
= control target key end

     0   :  { %12 = vsyncpa [#allocation3], 0  ;;  %s2494_s0 = inlined_call_operand.vmem [shape: f32[4,512], index: 0, kind: input, shape index: {}]   ;;  %s2495_s1 = inlined_call_operand.vmem [shape: f32[128,4], index: 1, kind: input, shape index: {}]   ;;  %s2496_s2 = inlined_call_operand.vmem [shape: f32[128,1], index: 2, kind: input, shape index: {}]   ;;  %s2497_s3 = inlined_call_operand.vmem [shape: bf16[128,128], index: 3, kind: input, shape index: {}]   ;;  %s2498_s4 = inlined_call_operand.vmem [shape: f32[128,1], index: 4, kind: input, shape index: {}]   ;;  %s2499_s5 = inlined_call_operand.vmem [shape: bf16[8,128], index: 5, kind: input, shape index: {}]   ;;  %s2500_s6 = inlined_call_operand.vmem [shape: f32[8,1], index: 6, kind: input, shape index: {}]   ;;  %s2501_s7 = inlined_call_operand.hbm [shape: f32[2,512], index: 7, kind: output, shape index: {}]  }
   0x1   :  { %14 = vsyncpa [#allocation3 + $0x1], 0  ;;  %s1773_s24 = smov 0   ;;  %s1775_s25 = smov 0  }
   0x2   :  { %s1777_s26 = smov 0   ;;  %s1779_s27 = smov 0  }
   0x3 LB: > { %s1794_s28 = sadd.s32 4294967295, %s1726_s27   ;;  %s1538_s29 = sadd.s32 4294967294, %s1726_s27   ;;  %s1726_s27 = sphi %s1779_s27, %s2530_s27   ;;  %s1722_s26 = sphi %s1777_s26, %s2529_s26   ;;  %s1718_s25 = sphi %s1775_s25, %s2528_s25   ;;  %s1714_s24 = sphi %s1773_s24, %s2527_s24  }
   0x4   : > { %s1798_s30 = sadd.s32 1, %s1726_s27   ;;  %s179_s8 = sadd.s32 1, %s1722_s26 }
   0x5   : > { %s176_s9 = ssub.s32 %s1726_s27, %s1798_s30  ;;  %p189_p0 = scmp.ne.s32.totalorder %s1722_s26, %s1718_s25 }
   0x6   : > { %p177_p1 = scmp.eq.s32.totalorder %s176_s9, 0  ;;  %p190_p2 = scmp.eq.s32.totalorder %s1794_s28, 1 }
   0x7   : > { %p195_p3 = scmp.ne.s32.totalorder %s1718_s25, %s1714_s24  ;;  %p196_p4 = scmp.eq.s32.totalorder %s1538_s29, 1 }
   0x8   : > { %s1809_s10 = scalar_select %p177_p1, %s1722_s26, %s179_s8  }
   0x9   : > { %p1811_p5 = por %p190_p2, %p189_p0  ;;  %p1815_p6 = por %p196_p4, %p195_p3 }
   0xa   : > { %p1541_p7 = scmp.ge.s32.totalorder %s1726_s27, 1  ;;  %p241_p8 = scmp.lt.s32.totalorder %s1726_s27, 3 }
   0xc   : > { %p242_p9 = pnand %p1541_p7, %p241_p8 }
   0xe   : > { %245 = sbr.rel (%p242_p9) target bundleno = 971 (0x3cb), region = 48 }
  0x15   : > { %v298_v0 = vld [vmem:[%s2496_s2] sm:$0xff]  ;;  %v1827_v1 = vld [vmem:[%s2495_s1 + $0x10] sm:$0xff]  ;;  %v2507_v2 = vmov 2   ;;  %v2505_v3 = vmov 0   ;;  %v299_v4 = vld [vmem:[%s2496_s2 + $0x8] sm:$0xff]  ;;  %v2504_v8 = vmov 1   ;;  %v395_v59 = vlaneseq }
  0x16   : > { %1611 = vset.pattern.permute.xlu0 %v2507_v2  ;;  %1603 = vset.pattern.permute.xlu1 %v2505_v3  ;;  %v1838_v5 = vld [vmem:[%s2495_s1 + $0x30] sm:$0xff]  ;;  %v1851_v7 = vld [vmem:[%s2495_s1 + $0x8] sm:$0xff]  ;;  %v282_v9 = vld [vmem:[%s2495_s1] sm:$0xff]  ;;  %v2502_v16 = vmov 3   ;;  %s1543_s17 = sshll.u32 %s1794_s28, 1  ;;  %s270_s22 = sand.u32 1, %s1718_s25  }
  0x17   : > { %447 = vperm.xlu1 %1603, %v298_v0   ;;  %712 = vperm.xlu0 %1611, %v1827_v1   ;;  %v1846_v6 = vld [vmem:[%s2495_s1 + $0x50] sm:$0xff]  ;;  %v285_v10 = vld [vmem:[%s2495_s1 + $0x18] sm:$0xff]  ;;  %v303_v13 = vld [vmem:[%s2496_s2 + $0x28] sm:$0xff]  ;;  %p274_p10 = scmp.lt.s32.totalorder %s1543_s17, 3  ;;  %v396_v62 = vshrl.u32 %v395_v59, 7  ;;  %s1559_s29 = sshll.u32 %s1794_s28, 6 }
  0x18   : > { %1235 = vmatprep.mubr.bf16.mxu0 %v2505_v3  ;;  %1403 = vmatprep.mubr.bf16.mxu1 %v2505_v3  ;;  %v300_v11 = vld [vmem:[%s2496_s2 + $0x10] sm:$0xff]  ;;  %v301_v12 = vld [vmem:[%s2496_s2 + $0x18] sm:$0xff]  ;;  %v307_v17 = vld [vmem:[%s2496_s2 + $0x48] sm:$0xff]  ;;  %s2452_s15 = scalar_lea.hbm %s2501_s7, %s1559_s29  ;;  %s1465_s16 = scalar_lea.sflag [#allocation3], %s270_s22 }
  0x19   : > { %v1881_v14 = vld [vmem:[%s2495_s1 + $0x38] sm:$0xff]  ;;  %v304_v15 = vld [vmem:[%s2496_s2 + $0x30] sm:$0xff]  ;;  %v286_v18 = vld [vmem:[%s2495_s1 + $0x20] sm:$0xff]  ;;  %s2532_s17 = smov (!%p274_p10, %s1543_s17), 3  ;;  %s1732_s28 = smov [#allocation2]  }
  0x1a   : > { %v1899_v19 = vld [vmem:[%s2495_s1 + $0x58] sm:$0xff]  ;;  %v287_v20 = vld [vmem:[%s2495_s1 + $0x28] sm:$0xff]  ;;  %v308_v21 = vld [vmem:[%s2496_s2 + $0x50] sm:$0xff]  ;;  %s1544_s20 = sshll.u32 %s2532_s17, 2  ;;  %s1668_s18 = sshll.u32 %s1732_s28, 4  ;;  %s1669_s18 = int_to_ptr.vmem [resolvable:$false] %s1668_s18 }
  0x1b   : > { %452 = vperm.xlu1 %1603, %v299_v4   ;;  %728 = vperm.xlu0 %1611, %v1838_v5   ;;  %v311_v22 = vld [vmem:[%s2496_s2 + $0x68] sm:$0xff]  ;;  %v1915_v23 = vld [vmem:[%s2495_s1 + $0x78] sm:$0xff]  ;;  %v302_v24 = vld [vmem:[%s2496_s2 + $0x20] sm:$0xff]  ;;  %s277_s23 = scalar_lea.vmem %s2494_s0, %s1544_s20  ;;  %v401_v4 = vsub.s32 4, %v396_v62  ;;  %s1670_s19 = scalar_lea.vmem %s1669_s18, 128 }
  0x1c   : > { %v312_v25 = vld [vmem:[%s2496_s2 + $0x70] sm:$0xff]  ;;  %v305_v27 = vld [vmem:[%s2496_s2 + $0x38] sm:$0xff]  ;;  %v290_v28 = vld [vmem:[%s2495_s1 + $0x40] sm:$0xff] }
  0x1d   : > { %v1936_v26 = vld [vmem:[%s2495_s1 + $0x70] sm:$0xff]  ;;  %v291_v29 = vld [vmem:[%s2495_s1 + $0x48] sm:$0xff]  ;;  %v306_v31 = vld [vmem:[%s2496_s2 + $0x40] sm:$0xff] }
  0x1e   : > { %v1962_v30 = vld [vmem:[%s2495_s1 + $0x68] sm:$0xff]  ;;  %v309_v43 = vld [vmem:[%s2496_s2 + $0x58] sm:$0xff]  ;;  %v2025_v51 = vld [vmem:[%s2495_s1 + $0x60] sm:$0xff] }
  0x1f   : > { %1604 = vset.pattern.permute.xlu1 %v2504_v8  ;;  %744 = vperm.xlu0 %1611, %v1846_v6   ;;  %v310_v58 = vld [vmem:[%s2496_s2 + $0x60] sm:$0xff] }
  0x20   : > { %562 = vperm.xlu1 %1604, %v1851_v7  }
  0x23   : > { %1632 = vset.pattern.permute.xlu0 %v2505_v3 }
  0x24   : > { %1605 = vset.pattern.permute.xlu1 %v2505_v3  ;;  %316 = vperm.xlu0 %1632, %v282_v9  }
  0x25   : > { %326 = vperm.xlu1 %1605, %v1827_v1  }
  0x28   : > { %321 = vperm.xlu0 %1632, %v1851_v7  }
  0x29   : > { %1606 = vset.pattern.permute.xlu1 %v2507_v2 }
  0x2a   : > { %704 = vperm.xlu1 %1606, %v282_v9  }
  0x2c   : > { %331 = vperm.xlu0 %1632, %v285_v10  }
  0x2e   : > { %708 = vperm.xlu1 %1606, %v1851_v7  }
  0x30   : > { %457 = vperm.xlu0 %1632, %v300_v11   ;;  %v773_v11 = vsub.s32 6, %v396_v62 }
  0x32   : > { %1607 = vset.pattern.permute.xlu1 %v2505_v3 }
  0x33   : > { %462 = vperm.xlu1 %1607, %v301_v12  }
  0x34   : > { %472 = vperm.xlu0 %1632, %v303_v13  }
  0x37   : > { %1608 = vset.pattern.permute.xlu1 %v2504_v8 }
  0x38   : > { %351 = vperm.xlu0 %1632, %v1881_v14   ;;  %570 = vperm.xlu1 %1608, %v285_v10  }
  0x3c   : > { %477 = vperm.xlu0 %1632, %v304_v15   ;;  %1609 = vset.pattern.permute.xlu1 %v2502_v16  ;;  %v915_v15 = vsub.s32 3, %v396_v62 }
  0x3d   : > { %850 = vperm.xlu1 %1609, %v282_v9  }
  0x40   : > { %492 = vperm.xlu0 %1632, %v307_v17   ;;  %v919_v17 = vsub.s32 7, %v396_v62 }
  0x41   : > { %1610 = vset.pattern.permute.xlu1 %v2505_v3 }
  0x42   : > { %336 = vperm.xlu1 %1610, %v286_v18  }
  0x44   : > { %371 = vperm.xlu0 %1632, %v1899_v19  }
  0x46   : > { %341 = vperm.xlu1 %1610, %v287_v20  }
  0x48   : > { %497 = vperm.xlu0 %1632, %v308_v21  }
  0x4a   : > { %1612 = vset.pattern.permute.xlu1 %v2507_v2 }
  0x4b   : > { %716 = vperm.xlu1 %1612, %v285_v10  }
  0x4c   : > { %512 = vperm.xlu0 %1632, %v311_v22  }
  0x4f   : > { %1613 = vset.pattern.permute.xlu1 %v2505_v3 }
  0x50   : > { %391 = vperm.xlu0 %1632, %v1915_v23   ;;  %467 = vperm.xlu1 %1613, %v302_v24  }
  0x54   : > { %517 = vperm.xlu0 %1632, %v312_v25   ;;  %1614 = vset.pattern.permute.xlu1 %v2504_v8 }
  0x55   : > { %574 = vperm.xlu1 %1614, %v286_v18  }
  0x58   : > { %1639 = vset.pattern.permute.xlu0 %v2504_v8 }
  0x59   : > { %558 = vperm.xlu0 %1639, %v282_v9   ;;  %578 = vperm.xlu1 %1614, %v287_v20  }
  0x5d   : > { %566 = vperm.xlu0 %1639, %v1827_v1   ;;  %1615 = vset.pattern.permute.xlu1 %v2502_v16 }
  0x5e   : > { %862 = vperm.xlu1 %1615, %v285_v10   ;;  %v769_v10 = vsub.s32 2, %v396_v62 }
  0x61   : > { %582 = vperm.xlu0 %1639, %v1838_v5  }
  0x62   : > { %1616 = vset.pattern.permute.xlu1 %v2505_v3 }
  0x63   : > { %346 = vperm.xlu1 %1616, %v1838_v5  }
  0x65   : > { %598 = vperm.xlu0 %1639, %v1846_v6  }
  0x67   : > { %1617 = vset.pattern.permute.xlu1 %v2507_v2 }
  0x68   : > { %720 = vperm.xlu1 %1617, %v286_v18  }
  0x69   : > { %614 = vperm.xlu0 %1639, %v1936_v26  }
  0x6c   : > { %724 = vperm.xlu1 %1617, %v287_v20  }
  0x6d   : > { %1641 = vset.pattern.permute.xlu0 %v2502_v16 }
  0x6e   : > { %854 = vperm.xlu0 %1641, %v1851_v7   ;;  %v627_v7 = vsub.s32 5, %v396_v62 }
  0x70   : > { %1618 = vset.pattern.permute.xlu1 %v2505_v3 }
  0x71   : > { %482 = vperm.xlu1 %1618, %v305_v27  }
  0x72   : > { %858 = vperm.xlu0 %1641, %v1827_v1   ;;  %v397_v1 = vsub.s32 0, %v396_v62 }
  0x75   : > { %1619 = vset.pattern.permute.xlu1 %v2504_v8 }
  0x76   : > { %870 = vperm.xlu0 %1641, %v287_v20   ;;  %586 = vperm.xlu1 %1619, %v1881_v14  }
  0x7a   : > { %874 = vperm.xlu0 %1641, %v1838_v5   ;;  %1620 = vset.pattern.permute.xlu1 %v2502_v16  ;;  %v281_v5 = vld [vmem:[%s277_s23] sm:$0xff]  ;;  %s1542_s23 = sshll.u32 %s270_s22, 2 }
  0x7b   : > { %866 = vperm.xlu1 %1620, %v286_v18   ;;  %v398_v12 = vrot.slane %v281_v5, %v397_v1  ;;  %v628_v20 = vrot.slane %v281_v5, %v627_v7  ;;  %v770_v21 = vrot.slane %v281_v5, %v769_v10  ;;  %v774_v22 = vrot.slane %v281_v5, %v773_v11  ;;  %s272_s8 = scalar_lea.vmem [#allocation2], %s1542_s23 }
  0x7c   : > { %s1479_s9 = sshll.u32 %s272_s8, 4  ;;  %s2454_s9 = int_to_ptr.vmem [resolvable:$true] %s1479_s9 }
  0x7d   : > { %v2067_v24 = vrot.slane %v398_v12, %v397_v1  ;;  %s1664_s17 = scalar_lea.vmem %s2454_s9, 64  ;;  %p1671_p0 = scmp.lt.s32.totalorder %s2454_s9, %s1669_s18 }
  0x7e   : > { %886 = vperm.xlu0 %1641, %v291_v29   ;;  %p1665_p11 = scmp.ne.s32.totalorder %s2454_s9, %s1664_s17  ;;  %p1672_p1 = scmp.lt.s32.totalorder %s1670_s19, %s1664_s17 }
  0x7f   : > { %1621 = vset.pattern.permute.xlu1 %v2505_v3 }
  0x80   : > { %356 = vperm.xlu1 %1621, %v290_v28   ;;  %p1666_p12 = pnand %p1665_p11, %p1811_p5  ;;  %p1673_p2 = por %p1672_p1, %p1671_p0 }
  0x82   : > { %890 = vperm.xlu0 %1641, %v1846_v6   ;;  %p1667_p13 = pneg %p1666_p12 }
  0x84   : > { %361 = vperm.xlu1 %1621, %v291_v29   ;;  %p1674_p3 = pnand %p1673_p2, %p1667_p13 }
  0x86   : > { %902 = vperm.xlu0 %1641, %v1962_v30  }
  0x88   : > { %1622 = vset.pattern.permute.xlu1 %v2507_v2 }
  0x89   : > { %732 = vperm.xlu1 %1622, %v1881_v14  }
  0x8a   : > { %906 = vperm.xlu0 %1641, %v1936_v26  }
  0x8d   : > { %1623 = vset.pattern.permute.xlu1 %v2505_v3 }
  0x8e   : > { %487 = vperm.xlu1 %1623, %v306_v31   ;;  %1646 = vset.pattern.permute.xlu0 %v2505_v3  ;;  %v920_v31 = vrot.slane %v281_v5, %v919_v17 }
  0x92   : > { %1624 = vset.pattern.permute.xlu1 %v2504_v8 }
  0x93   : > { %590 = vperm.xlu1 %1624, %v290_v28  }
  0x96   : > { %v1974_v32 = vpop.permute.xlu1 %447  ;;  %v1976_v33 = vpop.permute.xlu0 %712 }
  0x97   : > { %594 = vperm.xlu1 %1624, %v291_v29  }
  0x9a   : > { %v1978_v34 = vpop.permute.xlu1 %452  ;;  %v1980_v35 = vpop.permute.xlu0 %728 }
  0x9b   : > { %1625 = vset.pattern.permute.xlu1 %v2502_v16 }
  0x9c   : > { %878 = vperm.xlu1 %1625, %v1881_v14   ;;  %v402_v14 = vrot.slane %v281_v5, %v401_v4  ;;  %v2083_v4 = vrot.slane %v774_v22, %v769_v10 }
  0x9e   : > { %v1984_v36 = vpop.permute.xlu0 %744 }
  0x9f   : > { %v1986_v37 = vpop.permute.xlu1 %562 }
  0xa0   : > { %1626 = vset.pattern.permute.xlu1 %v2505_v3 }
  0xa1   : > { %366 = vperm.xlu1 %1626, %v1846_v6   ;;  %v623_v6 = vsub.s32 1, %v396_v62  ;;  %v2081_v62 = vrot.slane %v770_v21, %v769_v10 }
  0xa3   : > { %v1990_v38 = vpop.permute.xlu0 %316  ;;  %v624_v18 = vrot.slane %v281_v5, %v623_v6  ;;  %v2079_v59 = vrot.slane %v628_v20, %v623_v6  ;;  %v2099_v10 = vmul.f32 %v2081_v62, %v1976_v33 }
  0xa4   : > { %v1992_v39 = vpop.permute.xlu1 %326 }
  0xa5   : > { %1627 = vset.pattern.permute.xlu1 %v2507_v2 }
  0xa6   : > { %736 = vperm.xlu1 %1627, %v290_v28  }
  0xa7   : > { %v1995_v40 = vpop.permute.xlu0 %321 }
  0xa9   : > { %v1997_v41 = vpop.permute.xlu1 %704 }
  0xaa   : > { %740 = vperm.xlu1 %1627, %v291_v29   ;;  %v916_v29 = vrot.slane %v281_v5, %v915_v15  ;;  %v413_v5 = vmul.f32 %v2067_v24, %v1990_v38 }
  0xab   : > { %v1999_v42 = vpop.permute.xlu0 %331 }
  0xac   : > { %v2091_v12 = vrot.slane %v916_v29, %v915_v15 }
  0xad   : > { %v2004_v44 = vpop.permute.xlu1 %708 }
  0xae   : > { %1628 = vset.pattern.permute.xlu1 %v2505_v3  ;;  %v787_v22 = vmul.f32 %v2081_v62, %v2004_v44 }
  0xaf   : > { %v2007_v45 = vpop.permute.xlu0 %457  ;;  %502 = vperm.xlu1 %1628, %v309_v43   ;;  %v415_v43 = vmul.f32 %v2067_v24, %v1995_v40 }
  0xb1   : > { %v527_v17 = vadd.f32 %v1978_v34, %v415_v43  ;;  %v785_v43 = vmul.f32 %v2081_v62, %v1997_v41 }
  0xb2   : > { %v2009_v46 = vpop.permute.xlu1 %462 }
  0xb3   : > { %1629 = vset.pattern.permute.xlu1 %v2504_v8  ;;  %v2012_v47 = vpop.permute.xlu0 %472 }
  0xb4   : > { %602 = vperm.xlu1 %1629, %v1899_v19  }
  0xb7   : > { %v2015_v48 = vpop.permute.xlu1 %570  ;;  %v2017_v49 = vpop.permute.xlu0 %351 }
  0xb8   : > { %1630 = vset.pattern.permute.xlu1 %v2502_v16 }
  0xb9   : > { %882 = vperm.xlu1 %1630, %v290_v28   ;;  %v2071_v28 = vrot.slane %v402_v14, %v397_v1  ;;  %v797_v14 = vmul.f32 %v2081_v62, %v1980_v35 }
  0xbb   : > { %v2020_v50 = vpop.permute.xlu0 %477  ;;  %v416_v1 = vmul.f32 %v2071_v28, %v1995_v40  ;;  %v414_v11 = vmul.f32 %v2071_v28, %v1990_v38  ;;  %v2103_v40 = vmul.f32 %v2083_v4, %v1976_v33  ;;  %v798_v38 = vmul.f32 %v2083_v4, %v1980_v35 }
  0xbc   : > { %v2027_v52 = vpop.permute.xlu1 %850  ;;  %v417_v33 = vmul.f32 %v2067_v24, %v1992_v39  ;;  %v418_v20 = vmul.f32 %v2071_v28, %v1992_v39  ;;  %v419_v39 = vmul.f32 %v2067_v24, %v1999_v42 }
  0xbd   : > { %1631 = vset.pattern.permute.xlu1 %v2505_v3  ;;  %v528_v21 = vadd.f32 %v1978_v34, %v416_v1  ;;  %v420_v34 = vmul.f32 %v2071_v28, %v1999_v42  ;;  %v788_v1 = vmul.f32 %v2083_v4, %v2004_v44 }
  0xbe   : > { %376 = vperm.xlu1 %1631, %v2025_v51  }
  0xbf   : > { %v2031_v53 = vpop.permute.xlu0 %492 }
  0xc1   : > { %v2033_v54 = vpop.permute.xlu1 %336 }
  0xc2   : > { %381 = vperm.xlu1 %1631, %v1962_v30  }
  0xc3   : > { %v2037_v55 = vpop.permute.xlu0 %371 }
  0xc4   : > { %2515 = vst [vmem:[#allocation5_spill] sm:$0xff] %v2037_v55 }
  0xc5   : > { %v2039_v56 = vpop.permute.xlu1 %341 }
  0xc6   : > { %1633 = vset.pattern.permute.xlu1 %v2507_v2 }
  0xc7   : > { %748 = vperm.xlu1 %1633, %v1899_v19   ;;  %v2043_v57 = vpop.permute.xlu0 %497 }
  0xca   : > { %v2048_v60 = vpop.permute.xlu1 %716 }
  0xcb   : > { %1634 = vset.pattern.permute.xlu1 %v2505_v3  ;;  %v2051_v61 = vpop.permute.xlu0 %512 }
  0xcc   : > { %2516 = vst [vmem:[#allocation6_spill] sm:$0xff] %v2051_v61  ;;  %507 = vperm.xlu1 %1634, %v310_v58   ;;  %v2077_v58 = vrot.slane %v624_v18, %v623_v6  ;;  %v642_v18 = vmul.f32 %v2079_v59, %v1986_v37 }
  0xcf   : > { %v2053_v63 = vpop.permute.xlu1 %467  ;;  %v2055_v0 = vpop.permute.xlu0 %391 }
  0xd0   : > { %2517 = vst [vmem:[#allocation7_spill] sm:$0xff] %v2055_v0  ;;  %1635 = vset.pattern.permute.xlu1 %v2504_v8 }
  0xd1   : > { %606 = vperm.xlu1 %1635, %v2025_v51  }
  0xd3   : > { %v2062_v9 = vpop.permute.xlu0 %517 }
  0xd4   : > { %2518 = vst [vmem:[#allocation8_spill] sm:$0xff] %v2062_v9  ;;  %v2064_v13 = vpop.permute.xlu1 %574  ;;  %v529_v9 = vadd.f32 %v2007_v45, %v417_v33 }
  0xd5   : > { %610 = vperm.xlu1 %1635, %v1962_v30  }
  0xd8   : > { %v559_v25 = vpop.permute.xlu0 %558  ;;  %v2069_v27 = vpop.permute.xlu1 %578 }
  0xd9   : > { %1636 = vset.pattern.permute.xlu1 %v2502_v16  ;;  %v639_v35 = vmul.f32 %v2077_v58, %v559_v25  ;;  %v640_v16 = vmul.f32 %v2079_v59, %v559_v25  ;;  %v2519_v25 = vmov 2  }
  0xda   : > { %894 = vperm.xlu1 %1636, %v1899_v19   ;;  %v2093_v19 = vrot.slane %v920_v31, %v915_v15  ;;  %v641_v15 = vmul.f32 %v2077_v58, %v1986_v37  ;;  %v525_v31 = vadd.f32 %v1974_v32, %v413_v5  ;;  %v526_v37 = vadd.f32 %v1974_v32, %v414_v11 }
  0xdc   : > { %v567_v7 = vpop.permute.xlu0 %566  ;;  %v673_v8 = vadd.f32 %v641_v15, %v527_v17  ;;  %v674_v17 = vadd.f32 %v642_v18, %v528_v21  ;;  %v786_v15 = vmul.f32 %v2083_v4, %v1997_v41  ;;  %v671_v42 = vadd.f32 %v639_v35, %v525_v31 }
  0xdd   : > { %v2095_v6 = vpop.permute.xlu1 %862  ;;  %v672_v61 = vadd.f32 %v640_v16, %v526_v37  ;;  %v645_v18 = vmul.f32 %v2077_v58, %v2015_v48  ;;  %v531_v21 = vadd.f32 %v2009_v46, %v419_v39  ;;  %v644_v31 = vmul.f32 %v2079_v59, %v567_v7 }
  0xde   : > { %1637 = vset.pattern.permute.xlu1 %v2505_v3  ;;  %v819_v0 = vadd.f32 %v787_v22, %v673_v8  ;;  %v646_v8 = vmul.f32 %v2079_v59, %v2015_v48  ;;  %v820_v41 = vadd.f32 %v788_v1, %v674_v17  ;;  %v532_v22 = vadd.f32 %v2009_v46, %v420_v34 }
  0xdf   : > { %386 = vperm.xlu1 %1637, %v1936_v26   ;;  %v818_v46 = vadd.f32 %v786_v15, %v672_v61  ;;  %v677_v39 = vadd.f32 %v645_v18, %v531_v21  ;;  %v791_v1 = vmul.f32 %v2081_v62, %v2048_v60  ;;  %v932_v61 = vmul.f32 %v2093_v19, %v2027_v52 }
  0xe0   : > { %v583_v29 = vpop.permute.xlu0 %582  ;;  %v678_v34 = vadd.f32 %v646_v8, %v532_v22  ;;  %v2520_v17 = vmov 0  }
  0xe1   : > { %v651_v5 = vmul.f32 %v2077_v58, %v583_v29  ;;  %v652_v32 = vmul.f32 %v2079_v59, %v583_v29 }
  0xe2   : > { %v347_v3 = vpop.permute.xlu1 %346 }
  0xe3   : > { %v425_v11 = vmul.f32 %v2067_v24, %v347_v3  ;;  %v426_v2 = vmul.f32 %v2071_v28, %v347_v3  ;;  %1638 = vset.pattern.permute.xlu1 %v2519_v25  ;;  %v530_v3 = vadd.f32 %v2007_v45, %v418_v20  ;;  %v424_v45 = vmul.f32 %v2071_v28, %v2039_v56 }
  0xe4   : > { %752 = vperm.xlu1 %1638, %v2025_v51   ;;  %v2143_v44 = vpop.permute.xlu0 %598  ;;  %v643_v20 = vmul.f32 %v2077_v58, %v567_v7  ;;  %v931_v7 = vmul.f32 %v2091_v12, %v2027_v52 }
  0xe5   : > { %v537_v29 = vadd.f32 %v2020_v50, %v425_v11  ;;  %v538_v55 = vadd.f32 %v2020_v50, %v426_v2  ;;  %v423_v2 = vmul.f32 %v2067_v24, %v2039_v56  ;;  %v817_v50 = vadd.f32 %v785_v43, %v671_v42 }
  0xe6   : > { %v792_v56 = vmul.f32 %v2083_v4, %v2048_v60  ;;  %v536_v60 = vadd.f32 %v2012_v47, %v424_v45  ;;  %v938_v11 = vmul.f32 %v2093_v19, %v2095_v6  ;;  %v675_v52 = vadd.f32 %v643_v20, %v529_v9 }
  0xe7   : > { %v683_v35 = vadd.f32 %v651_v5, %v537_v29  ;;  %v684_v33 = vadd.f32 %v652_v32, %v538_v55  ;;  %v2155_v16 = vpop.permute.xlu1 %720  ;;  %v535_v5 = vadd.f32 %v2012_v47, %v423_v2  ;;  %v937_v32 = vmul.f32 %v2091_v12, %v2095_v6 }
  0xe8   : > { %756 = vperm.xlu1 %1638, %v1962_v30   ;;  %v2163_v48 = vpop.permute.xlu0 %614  ;;  %v313_v30 = vld [vmem:[%s2496_s2 + $0x78] sm:$0xff]  ;;  %v676_v15 = vadd.f32 %v644_v31, %v530_v3  ;;  %v964_v29 = vadd.f32 %v932_v61, %v818_v46  ;;  %v963_v18 = vadd.f32 %v931_v7, %v817_v50  ;;  %v824_v8 = vadd.f32 %v792_v56, %v678_v34 }
  0xe9   : > { %v2166_v37 = vadd.f32 %v797_v14, %v683_v35  ;;  %v2168_v55 = vadd.f32 %v798_v38, %v684_v33  ;;  %v421_v14 = vmul.f32 %v2067_v24, %v2033_v54  ;;  %v422_v38 = vmul.f32 %v2071_v28, %v2033_v54 }
  0xea   : > { %v823_v54 = vadd.f32 %v791_v1, %v677_v39  ;;  %v647_v6 = vmul.f32 %v2077_v58, %v2064_v13  ;;  %v649_v9 = vmul.f32 %v2077_v58, %v2069_v27  ;;  %v970_v33 = vadd.f32 %v938_v11, %v824_v8 }
  0xeb   : > { %v725_v43 = vpop.permute.xlu1 %724  ;;  %v533_v22 = vadd.f32 %v2053_v63, %v421_v14  ;;  %v534_v35 = vadd.f32 %v2053_v63, %v422_v38  ;;  %v821_v31 = vadd.f32 %v2099_v10, %v675_v52  ;;  %v822_v46 = vadd.f32 %v2103_v40, %v676_v15 }
  0xec   : > { %1640 = vset.pattern.permute.xlu1 %v2520_v17  ;;  %v969_v3 = vadd.f32 %v937_v32, %v823_v54  ;;  %v2521_v39 = vmov 1   ;;  %v996_v63 = vmax.f32 %v964_v29, 0.0  ;;  %v995_v34 = vmax.f32 %v963_v18, 0.0 }
  0xed   : > { %v855_v42 = vpop.permute.xlu0 %854  ;;  %522 = vperm.xlu1 %1640, %v313_v30   ;;  %v650_v10 = vmul.f32 %v2079_v59, %v2069_v27  ;;  %v681_v7 = vadd.f32 %v649_v9, %v535_v5  ;;  %v795_v40 = vmul.f32 %v2081_v62, %v725_v43  ;;  %v1002_v52 = vmax.f32 %v970_v33, 0.0 }
  0xee   : > { %v933_v21 = vmul.f32 %v2091_v12, %v855_v42  ;;  %v934_v47 = vmul.f32 %v2093_v19, %v855_v42  ;;  %v1001_v11 = vmax.f32 %v969_v3, 0.0  ;;  %v793_v15 = vmul.f32 %v2081_v62, %v2155_v16 }
  0xef   : > { %v796_v42 = vmul.f32 %v2083_v4, %v725_v43  ;;  %v2522_v8 = vmov 3   ;;  %v827_v3 = vadd.f32 %v795_v40, %v681_v7  ;;  %v427_v7 = vmul.f32 %v2067_v24, %v2017_v49 }
  0xf0   : > { %v965_v2 = vadd.f32 %v933_v21, %v819_v0  ;;  %v2200_v45 = vpop.permute.xlu1 %482  ;;  %v966_v50 = vadd.f32 %v934_v47, %v820_v41  ;;  %v648_v41 = vmul.f32 %v2079_v59, %v2064_v13  ;;  %v794_v13 = vmul.f32 %v2083_v4, %v2155_v16 }
  0xf1   : > { %v859_v20 = vpop.permute.xlu0 %858  ;;  %1642 = vset.pattern.permute.xlu1 %v2521_v39  ;;  %v679_v21 = vadd.f32 %v647_v6, %v533_v22  ;;  %v682_v47 = vadd.f32 %v650_v10, %v536_v60  ;;  %v428_v40 = vmul.f32 %v2071_v28, %v2017_v49 }
  0xf2   : > { %v935_v1 = vmul.f32 %v2091_v12, %v859_v20  ;;  %v936_v56 = vmul.f32 %v2093_v19, %v859_v20  ;;  %618 = vperm.xlu1 %1642, %v1915_v23   ;;  %v998_v30 = vmax.f32 %v966_v50, 0.0  ;;  %v997_v0 = vmax.f32 %v965_v2, 0.0 }
  0xf3   : > { %v680_v43 = vadd.f32 %v648_v41, %v534_v35  ;;  %v828_v50 = vadd.f32 %v796_v42, %v682_v47  ;;  %v825_v16 = vadd.f32 %v793_v15, %v679_v21  ;;  %v540_v15 = vadd.f32 %v2200_v45, %v428_v40 }
  0xf4   : > { %v967_v61 = vadd.f32 %v935_v1, %v821_v31  ;;  %v968_v14 = vadd.f32 %v936_v56, %v822_v46  ;;  %v1044_v38 = vpack.c.bf16 %v998_v30, %v996_v63  ;;  %v1043_v32 = vpack.c.bf16 %v997_v0, %v995_v34 }
  0xf5   : > { %v871_v29 = vpop.permute.xlu0 %870  ;;  %v587_v18 = vpop.permute.xlu1 %586  ;;  %v826_v20 = vadd.f32 %v794_v13, %v680_v43 }
  0xf6   : > { %v999_v27 = vmax.f32 %v967_v61, 0.0  ;;  %v1000_v5 = vmax.f32 %v968_v14, 0.0  ;;  %v941_v54 = vmul.f32 %v2091_v12, %v871_v29  ;;  %1643 = vset.pattern.permute.xlu1 %v2522_v8  ;;  %1203 = vmatprep.subr.bf16.mxu0 %v1044_v38  ;;  %v942_v9 = vmul.f32 %v2093_v19, %v871_v29 }
  0xf7   : > { %898 = vperm.xlu1 %1643, %v2025_v51   ;;  %1204 = vmatpush1.bf16.msra.mxu0 %v1043_v32  ;;  %v653_v14 = vmul.f32 %v2077_v58, %v587_v18  ;;  %v654_v38 = vmul.f32 %v2079_v59, %v587_v18 }
  0xf8   : > { %v1046_v33 = vpack.c.bf16 %v1002_v52, %v1000_v5  ;;  %v1045_v2 = vpack.c.bf16 %v1001_v11, %v999_v27  ;;  %v973_v31 = vadd.f32 %v941_v54, %v827_v3  ;;  %v974_v39 = vadd.f32 %v942_v9, %v828_v50 }
  0xf9   : > { %v875_v61 = vpop.permute.xlu0 %874  ;;  %v539_v52 = vadd.f32 %v2200_v45, %v427_v7  ;;  %v686_v49 = vadd.f32 %v654_v38, %v540_v15 }
  0xfa   : > { %v867_v46 = vpop.permute.xlu1 %866  ;;  %1205 = vmatprep.subr.bf16.mxu0 %v1046_v33  ;;  %v1005_v35 = vmax.f32 %v973_v31, 0.0  ;;  %v1006_v6 = vmax.f32 %v974_v39, 0.0  ;;  %v944_v11 = vmul.f32 %v2093_v19, %v875_v61 }
  0xfb   : > { %v939_v63 = vmul.f32 %v2091_v12, %v867_v46  ;;  %v940_v60 = vmul.f32 %v2093_v19, %v867_v46  ;;  %1644 = vset.pattern.permute.xlu1 %v2519_v25  ;;  %1206 = vmatpush1.bf16.msra.mxu0 %v1045_v2  ;;  %v685_v13 = vadd.f32 %v653_v14, %v539_v52 }
  0xfc   : > { %760 = vperm.xlu1 %1644, %v1936_v26   ;;  %v976_v5 = vadd.f32 %v944_v11, %v2168_v55 }
  0xfd   : > { %v971_v51 = vadd.f32 %v939_v63, %v825_v16  ;;  %v972_v22 = vadd.f32 %v940_v60, %v826_v20  ;;  %v659_v16 = vmul.f32 %v2077_v58, %v2143_v44  ;;  %v805_v60 = vmul.f32 %v2081_v62, %v1984_v36 }
  0xfe   : > { %v1008_v3 = vmax.f32 %v976_v5, 0.0 }
  0xff   : > { %v1003_v34 = vmax.f32 %v971_v51, 0.0  ;;  %v1004_v1 = vmax.f32 %v972_v22, 0.0  ;;  %v2226_v56 = vpop.permute.xlu1 %356  ;;  %v806_v51 = vmul.f32 %v2083_v4, %v1984_v36 }
 0x100   : > { %764 = vperm.xlu1 %1644, %v1915_v23   ;;  %v429_v38 = vmul.f32 %v2067_v24, %v2226_v56 }
 0x101   : > { %v1048_v30 = vpack.c.bf16 %v1006_v6, %v1004_v1  ;;  %v1047_v0 = vpack.c.bf16 %v1005_v35, %v1003_v34 }
 0x103   : > { %v362_v41 = vpop.permute.xlu1 %361  ;;  %1207 = vmatprep.subr.bf16.mxu0 %v1048_v30 }
 0x104   : > { %1645 = vset.pattern.permute.xlu1 %v2522_v8  ;;  %1208 = vmatpush1.bf16.msra.mxu0 %v1047_v0  ;;  %v431_v30 = vmul.f32 %v2067_v24, %v362_v41 }
 0x105   : > { %910 = vperm.xlu1 %1645, %v1915_v23   ;;  %v943_v23 = vmul.f32 %v2091_v12, %v875_v61 }
 0x106   : > { %v543_v36 = vadd.f32 %v2031_v53, %v431_v30 }
 0x107   : > { %v975_v27 = vadd.f32 %v943_v23, %v2166_v37  ;;  %v660_v37 = vmul.f32 %v2079_v59, %v2143_v44 }
 0x108   : > { %v733_v26 = vpop.permute.xlu1 %732 }
 0x109   : > { %1647 = vset.pattern.permute.xlu1 %v2520_v17  ;;  %v799_v42 = vmul.f32 %v2081_v62, %v733_v26  ;;  %v800_v29 = vmul.f32 %v2083_v4, %v733_v26  ;;  %v1007_v45 = vmax.f32 %v975_v27, 0.0 }
 0x10b   : > { %v831_v54 = vadd.f32 %v799_v42, %v685_v13  ;;  %v832_v8 = vadd.f32 %v800_v29, %v686_v49  ;;  %v887_v29 = vpop.permute.xlu0 %886 }
 0x10c   : > { %v949_v27 = vmul.f32 %v2091_v12, %v887_v29 }
 0x10d   : > { %v2232_v25 = vpop.permute.xlu1 %487 }
 0x10e   : > { %v541_v42 = vadd.f32 %v2232_v25, %v429_v38 }
 0x112   : > { %v591_v10 = vpop.permute.xlu1 %590 }
 0x113   : > { %v655_v23 = vmul.f32 %v2077_v58, %v591_v10  ;;  %v656_v11 = vmul.f32 %v2079_v59, %v591_v10 }
 0x116   : > { %v595_v32 = vpop.permute.xlu1 %594 }
 0x117   : > { %v657_v26 = vmul.f32 %v2077_v58, %v595_v32  ;;  %v658_v7 = vmul.f32 %v2079_v59, %v595_v32 }
 0x119   : > { %v689_v52 = vadd.f32 %v657_v26, %v543_v36  ;;  %v2523_v26 = vld [vmem:[#allocation5_spill] sm:$0xff] }
 0x11b   : > { %v879_v18 = vpop.permute.xlu1 %878 }
 0x11c   : > { %v945_v21 = vmul.f32 %v2091_v12, %v879_v18  ;;  %v946_v47 = vmul.f32 %v2093_v19, %v879_v18 }
 0x11e   : > { %v977_v9 = vadd.f32 %v945_v21, %v831_v54  ;;  %v978_v43 = vadd.f32 %v946_v47, %v832_v8  ;;  %v687_v54 = vadd.f32 %v655_v23, %v541_v42 }
 0x120   : > { %v1009_v33 = vmax.f32 %v977_v9, 0.0  ;;  %v1010_v2 = vmax.f32 %v978_v43, 0.0  ;;  %v367_v50 = vpop.permute.xlu1 %366 }
 0x121   : > { %v433_v55 = vmul.f32 %v2067_v24, %v367_v50  ;;  %v434_v20 = vmul.f32 %v2071_v28, %v367_v50 }
 0x122   : > { %v1050_v31 = vpack.c.bf16 %v1010_v2, %v1008_v3  ;;  %v1049_v46 = vpack.c.bf16 %v1009_v33, %v1007_v45 }
 0x123   : > { %v545_v39 = vadd.f32 %v2043_v57, %v433_v55  ;;  %v546_v63 = vadd.f32 %v2043_v57, %v434_v20  ;;  %v432_v57 = vmul.f32 %v2071_v28, %v362_v41  ;;  %v430_v41 = vmul.f32 %v2071_v28, %v2226_v56 }
 0x124   : > { %1209 = vmatprep.subr.bf16.mxu0 %v1050_v31  ;;  %v950_v56 = vmul.f32 %v2093_v19, %v887_v29 }
 0x125   : > { %v691_v22 = vadd.f32 %v659_v16, %v545_v39  ;;  %v692_v35 = vadd.f32 %v660_v37, %v546_v63  ;;  %v737_v44 = vpop.permute.xlu1 %736  ;;  %1210 = vmatpush1.bf16.msra.mxu0 %v1049_v46  ;;  %v544_v40 = vadd.f32 %v2031_v53, %v432_v57  ;;  %v542_v53 = vadd.f32 %v2232_v25, %v430_v41  ;;  %v1060_v63 = vld [vmem:[%s2498_s4 + $0x8] sm:$0xff]  ;;  %v891_v57 = vpop.permute.xlu0 %890 }
 0x126   : > { %v801_v13 = vmul.f32 %v2081_v62, %v737_v44  ;;  %v802_v49 = vmul.f32 %v2083_v4, %v737_v44  ;;  %1082 = vperm.xlu1 %1647, %v1060_v63   ;;  %v1063_v44 = vld [vmem:[%s2498_s4 + $0x20] sm:$0xff]  ;;  %v951_v23 = vmul.f32 %v2091_v12, %v891_v57 }
 0x127   : > { %v2262_v6 = vadd.f32 %v805_v60, %v691_v22  ;;  %v2264_v34 = vadd.f32 %v806_v51, %v692_v35  ;;  %v690_v32 = vadd.f32 %v658_v7, %v544_v40  ;;  %v688_v10 = vadd.f32 %v656_v11, %v542_v53  ;;  %v1059_v60 = vld [vmem:[%s2498_s4] sm:$0xff]  ;;  %v1061_v22 = vld [vmem:[%s2498_s4 + $0x10] sm:$0xff]  ;;  %v1062_v35 = vld [vmem:[%s2498_s4 + $0x18] sm:$0xff] }
 0x128   : > { %v833_v8 = vadd.f32 %v801_v13, %v687_v54  ;;  %1077 = vperm.xlu0 %1646, %v1059_v60   ;;  %v435_v7 = vmul.f32 %v2067_v24, %v2523_v26  ;;  %v1065_v40 = vld [vmem:[%s2498_s4 + $0x30] sm:$0xff]  ;;  %v952_v11 = vmul.f32 %v2093_v19, %v891_v57  ;;  %v1068_v13 = vld [vmem:[%s2498_s4 + $0x48] sm:$0xff] }
 0x129   : > { %v741_v1 = vpop.permute.xlu1 %740  ;;  %v834_v21 = vadd.f32 %v802_v49, %v688_v10 }
 0x12a   : > { %v803_v61 = vmul.f32 %v2081_v62, %v741_v1  ;;  %v804_v14 = vmul.f32 %v2083_v4, %v741_v1  ;;  %1087 = vperm.xlu1 %1647, %v1061_v22   ;;  %v1064_v1 = vld [vmem:[%s2498_s4 + $0x28] sm:$0xff] }
 0x12c   : > { %v835_v5 = vadd.f32 %v803_v61, %v689_v52  ;;  %v836_v18 = vadd.f32 %v804_v14, %v690_v32  ;;  %1092 = vperm.xlu0 %1646, %v1062_v35   ;;  %v1066_v61 = vld [vmem:[%s2498_s4 + $0x38] sm:$0xff]  ;;  %v436_v14 = vmul.f32 %v2071_v28, %v2523_v26 }
 0x12e   : > { %v2268_v0 = vpop.permute.xlu1 %502  ;;  %v981_v9 = vadd.f32 %v949_v27, %v835_v5  ;;  %v982_v43 = vadd.f32 %v950_v56, %v836_v18  ;;  %1097 = vperm.xlu1 %1647, %v1063_v44   ;;  %v983_v27 = vadd.f32 %v951_v23, %v2262_v6  ;;  %v984_v56 = vadd.f32 %v952_v11, %v2264_v34 }
 0x12f   : > { %v547_v52 = vadd.f32 %v2268_v0, %v435_v7  ;;  %v548_v42 = vadd.f32 %v2268_v0, %v436_v14 }
 0x130   : > { %v1014_v37 = vmax.f32 %v982_v43, 0.0  ;;  %v1013_v55 = vmax.f32 %v981_v9, 0.0  ;;  %1102 = vperm.xlu0 %1646, %v1064_v1   ;;  %v1015_v34 = vmax.f32 %v983_v27, 0.0  ;;  %v1016_v9 = vmax.f32 %v984_v56, 0.0  ;;  %v2524_v1 = vld [vmem:[#allocation6_spill] sm:$0xff] }
 0x132   : > { %1107 = vperm.xlu1 %1647, %v1065_v40  }
 0x133   : > { %v603_v15 = vpop.permute.xlu1 %602 }
 0x134   : > { %v661_v36 = vmul.f32 %v2077_v58, %v603_v15  ;;  %v662_v38 = vmul.f32 %v2079_v59, %v603_v15  ;;  %1112 = vperm.xlu0 %1646, %v1066_v61   ;;  %v1067_v15 = vld [vmem:[%s2498_s4 + $0x40] sm:$0xff] }
 0x136   : > { %v693_v29 = vadd.f32 %v661_v36, %v547_v52  ;;  %v694_v49 = vadd.f32 %v662_v38, %v548_v42  ;;  %1117 = vperm.xlu1 %1647, %v1067_v15  }
 0x138   : > { %v883_v47 = vpop.permute.xlu1 %882  ;;  %1122 = vperm.xlu0 %1646, %v1068_v13  }
 0x139   : > { %v947_v25 = vmul.f32 %v2091_v12, %v883_v47  ;;  %v948_v45 = vmul.f32 %v2093_v19, %v883_v47 }
 0x13b   : > { %v979_v3 = vadd.f32 %v947_v25, %v833_v8  ;;  %v980_v33 = vadd.f32 %v948_v45, %v834_v21  ;;  %v1069_v8 = vld [vmem:[%s2498_s4 + $0x50] sm:$0xff]  ;;  %v1070_v21 = vld [vmem:[%s2498_s4 + $0x58] sm:$0xff] }
 0x13c   : > { %1127 = vperm.xlu1 %1647, %v1069_v8   ;;  %1132 = vperm.xlu0 %1646, %v1070_v21  }
 0x13d   : > { %v1011_v2 = vmax.f32 %v979_v3, 0.0  ;;  %v1012_v50 = vmax.f32 %v980_v33, 0.0  ;;  %v2290_v16 = vpop.permute.xlu1 %376  ;;  %v1071_v3 = vld [vmem:[%s2498_s4 + $0x60] sm:$0xff] }
 0x13e   : > { %v437_v40 = vmul.f32 %v2067_v24, %v2290_v16  ;;  %v438_v61 = vmul.f32 %v2071_v28, %v2290_v16 }
 0x13f   : > { %v1052_v20 = vpack.c.bf16 %v1014_v37, %v1012_v50  ;;  %v1051_v31 = vpack.c.bf16 %v1013_v55, %v1011_v2  ;;  %v1072_v50 = vld [vmem:[%s2498_s4 + $0x68] sm:$0xff]  ;;  %v1073_v55 = vld [vmem:[%s2498_s4 + $0x70] sm:$0xff] }
 0x140   : > { %1137 = vperm.xlu1 %1647, %v1071_v3   ;;  %1142 = vperm.xlu0 %1646, %v1072_v50   ;;  %v668_v50 = vmul.f32 %v2079_v59, %v2163_v48 }
 0x141   : > { %v2292_v46 = vpop.permute.xlu1 %381  ;;  %1211 = vmatprep.subr.bf16.mxu0 %v1052_v20  ;;  %v1074_v20 = vld [vmem:[%s2498_s4 + $0x78] sm:$0xff] }
 0x142   : > { %1212 = vmatpush1.bf16.msra.mxu0 %v1051_v31  ;;  %v439_v63 = vmul.f32 %v2067_v24, %v2292_v46  ;;  %v440_v60 = vmul.f32 %v2071_v28, %v2292_v46 }
 0x144   : > { %1147 = vperm.xlu1 %1647, %v1073_v55   ;;  %1152 = vperm.xlu0 %1646, %v1074_v20   ;;  %v551_v57 = vadd.f32 %v2524_v1, %v439_v63  ;;  %v552_v26 = vadd.f32 %v2524_v1, %v440_v60  ;;  %v2526_v60 = vld [vmem:[#allocation7_spill] sm:$0xff] }
 0x146   : > { %v749_v39 = vpop.permute.xlu1 %748 }
 0x147   : > { %v807_v32 = vmul.f32 %v2081_v62, %v749_v39  ;;  %v808_v53 = vmul.f32 %v2083_v4, %v749_v39  ;;  %v1365_v39 = vld [vmem:[%s2500_s6] sm:$0xff] }
 0x148   : > { %1368 = vperm.xlu1 %1647, %v1365_v39  }
 0x149   : > { %v839_v5 = vadd.f32 %v807_v32, %v693_v29  ;;  %v840_v18 = vadd.f32 %v808_v53, %v694_v49  ;;  %v903_v53 = vpop.permute.xlu0 %902 }
 0x14a   : > { %v957_v16 = vmul.f32 %v2091_v12, %v903_v53  ;;  %v958_v29 = vmul.f32 %v2093_v19, %v903_v53 }
 0x14b   : > { %v2300_v51 = vpop.permute.xlu1 %507 }
 0x14c   : > { %v549_v11 = vadd.f32 %v2300_v51, %v437_v40  ;;  %v550_v52 = vadd.f32 %v2300_v51, %v438_v61 }
 0x14d   : > { %v907_v1 = vpop.permute.xlu0 %906 }
 0x150   : > { %v2314_v30 = vpop.permute.xlu1 %606 }
 0x151   : > { %v663_v46 = vmul.f32 %v2077_v58, %v2314_v30  ;;  %v664_v14 = vmul.f32 %v2079_v59, %v2314_v30 }
 0x153   : > { %v695_v49 = vadd.f32 %v663_v46, %v549_v11  ;;  %v696_v30 = vadd.f32 %v664_v14, %v550_v52 }
 0x154   : > { %v611_v41 = vpop.permute.xlu1 %610 }
 0x155   : > { %v665_v35 = vmul.f32 %v2077_v58, %v611_v41  ;;  %v666_v44 = vmul.f32 %v2079_v59, %v611_v41 }
 0x157   : > { %v697_v38 = vadd.f32 %v665_v35, %v551_v57  ;;  %v698_v41 = vadd.f32 %v666_v44, %v552_v26  ;;  %v443_v35 = vmul.f32 %v2067_v24, %v2526_v60  ;;  %v444_v44 = vmul.f32 %v2071_v28, %v2526_v60 }
 0x159   : > { %v895_v0 = vpop.permute.xlu1 %894 }
 0x15a   : > { %v953_v54 = vmul.f32 %v2091_v12, %v895_v0  ;;  %v954_v10 = vmul.f32 %v2093_v19, %v895_v0 }
 0x15c   : > { %v985_v6 = vadd.f32 %v953_v54, %v839_v5  ;;  %v986_v47 = vadd.f32 %v954_v10, %v840_v18 }
 0x15e   : > { %v1017_v43 = vmax.f32 %v985_v6, 0.0  ;;  %v1018_v25 = vmax.f32 %v986_v47, 0.0  ;;  %v387_v45 = vpop.permute.xlu1 %386  ;;  %v2525_v47 = vld [vmem:[#allocation8_spill] sm:$0xff] }
 0x15f   : > { %v441_v27 = vmul.f32 %v2067_v24, %v387_v45  ;;  %v442_v56 = vmul.f32 %v2071_v28, %v387_v45  ;;  %v959_v24 = vmul.f32 %v2091_v12, %v907_v1  ;;  %v960_v28 = vmul.f32 %v2093_v19, %v907_v1 }
 0x160   : > { %v1054_v33 = vpack.c.bf16 %v1018_v25, %v1016_v9  ;;  %v1053_v2 = vpack.c.bf16 %v1017_v43, %v1015_v34 }
 0x161   : > { %v553_v34 = vadd.f32 %v2525_v47, %v441_v27  ;;  %v554_v9 = vadd.f32 %v2525_v47, %v442_v56  ;;  %v1652_v27 = vld [vmem:[%s2497_s3 + $0x20] sm:$0xff]   ;;  %v1653_v56 = vld [vmem:[%s2497_s3 + $0x28] sm:$0xff]  }
 0x162   : > { %1213 = vmatprep.subr.bf16.mxu0 %v1054_v33 }
 0x163   : > { %v753_v37 = vpop.permute.xlu1 %752  ;;  %1214 = vmatpush1.bf16.msra.mxu0 %v1053_v2  ;;  %v667_v2 = vmul.f32 %v2077_v58, %v2163_v48  ;;  %v700_v63 = vadd.f32 %v668_v50, %v554_v9 }
 0x164   : > { %v809_v32 = vmul.f32 %v2081_v62, %v753_v37  ;;  %v810_v42 = vmul.f32 %v2083_v4, %v753_v37 }
 0x165   : > { %v699_v39 = vadd.f32 %v667_v2, %v553_v34 }
 0x166   : > { %v841_v5 = vadd.f32 %v809_v32, %v695_v49  ;;  %v842_v0 = vadd.f32 %v810_v42, %v696_v30  ;;  %v1648_v49 = vld [vmem:[%s2497_s3] sm:$0xff]   ;;  %v1651_v30 = vld [vmem:[%s2497_s3 + $0x18] sm:$0xff]  }
 0x167   : > { %v757_v31 = vpop.permute.xlu1 %756 }
 0x168   : > { %v811_v7 = vmul.f32 %v2081_v62, %v757_v31  ;;  %v812_v36 = vmul.f32 %v2083_v4, %v757_v31 }
 0x16a   : > { %v843_v15 = vadd.f32 %v811_v7, %v697_v38  ;;  %v844_v13 = vadd.f32 %v812_v36, %v698_v41 }
 0x16c   : > { %v523_v22 = vpop.permute.xlu1 %522  ;;  %v989_v18 = vadd.f32 %v957_v16, %v843_v15  ;;  %v990_v54 = vadd.f32 %v958_v29, %v844_v13 }
 0x16d   : > { %v555_v40 = vadd.f32 %v523_v22, %v443_v35  ;;  %v556_v61 = vadd.f32 %v523_v22, %v444_v44 }
 0x16e   : > { %v1022_v33 = vmax.f32 %v990_v54, 0.0  ;;  %v1021_v45 = vmax.f32 %v989_v18, 0.0 }
 0x171   : > { %v619_v23 = vpop.permute.xlu1 %618 }
 0x172   : > { %v669_v57 = vmul.f32 %v2077_v58, %v619_v23  ;;  %v670_v26 = vmul.f32 %v2079_v59, %v619_v23 }
 0x174   : > { %v701_v38 = vadd.f32 %v669_v57, %v555_v40  ;;  %v702_v41 = vadd.f32 %v670_v26, %v556_v61 }
 0x176   : > { %v899_v51 = vpop.permute.xlu1 %898 }
 0x177   : > { %v955_v10 = vmul.f32 %v2091_v12, %v899_v51  ;;  %v956_v8 = vmul.f32 %v2093_v19, %v899_v51 }
 0x179   : > { %v987_v21 = vadd.f32 %v955_v10, %v841_v5  ;;  %v988_v6 = vadd.f32 %v956_v8, %v842_v0  ;;  %v1654_v5 = vld [vmem:[%s2497_s3 + $0x30] sm:$0xff]   ;;  %v1655_v0 = vld [vmem:[%s2497_s3 + $0x38] sm:$0xff]  }
 0x17b   : > { %v1019_v43 = vmax.f32 %v987_v21, 0.0  ;;  %v1020_v25 = vmax.f32 %v988_v6, 0.0  ;;  %v761_v3 = vpop.permute.xlu1 %760 }
 0x17c   : > { %v813_v37 = vmul.f32 %v2081_v62, %v761_v3  ;;  %v814_v55 = vmul.f32 %v2083_v4, %v761_v3 }
 0x17d   : > { %v1056_v20 = vpack.c.bf16 %v1022_v33, %v1020_v25  ;;  %v1055_v31 = vpack.c.bf16 %v1021_v45, %v1019_v43 }
 0x17e   : > { %v845_v7 = vadd.f32 %v813_v37, %v699_v39  ;;  %v846_v36 = vadd.f32 %v814_v55, %v700_v63 }
 0x17f   : > { %v765_v48 = vpop.permute.xlu1 %764  ;;  %1215 = vmatprep.subr.bf16.mxu0 %v1056_v20 }
 0x180   : > { %1216 = vmatpush1.bf16.msra.mxu0 %v1055_v31  ;;  %v815_v46 = vmul.f32 %v2081_v62, %v765_v48  ;;  %v816_v14 = vmul.f32 %v2083_v4, %v765_v48  ;;  %v991_v58 = vadd.f32 %v959_v24, %v845_v7  ;;  %v992_v11 = vadd.f32 %v960_v28, %v846_v36 }
 0x182   : > { %v847_v23 = vadd.f32 %v815_v46, %v701_v38  ;;  %v848_v52 = vadd.f32 %v816_v14, %v702_v41  ;;  %v1024_v4 = vmax.f32 %v992_v11, 0.0  ;;  %v1023_v29 = vmax.f32 %v991_v58, 0.0 }
 0x184   : > { %v911_v59 = vpop.permute.xlu1 %910 }
 0x185   : > { %v961_v32 = vmul.f32 %v2091_v12, %v911_v59  ;;  %v962_v42 = vmul.f32 %v2093_v19, %v911_v59  ;;  %v1649_v12 = vld [vmem:[%s2497_s3 + $0x8] sm:$0xff]   ;;  %v1650_v19 = vld [vmem:[%s2497_s3 + $0x10] sm:$0xff]  }
 0x187   : > { %v993_v22 = vadd.f32 %v961_v32, %v847_v23  ;;  %v994_v53 = vadd.f32 %v962_v42, %v848_v52 }
 0x189   : > { %v1025_v62 = vmax.f32 %v993_v22, 0.0  ;;  %v1026_v16 = vmax.f32 %v994_v53, 0.0 }
 0x18b   : > { %v1058_v15 = vpack.c.bf16 %v1026_v16, %v1024_v4  ;;  %v1057_v13 = vpack.c.bf16 %v1025_v62, %v1023_v29 }
 0x18d   : > { %1217 = vmatprep.subr.bf16.mxu0 %v1058_v15 }
 0x18e   : > { %1218 = vmatpush1.bf16.msra.mxu0 %v1057_v13 }
 0x191   : > { %1236 = vmatmul.mubr.bf16.vlgmr.msra.gmra.mrb[0].mxu0 %v1648_v49 }
 0x192   : > { %1245 = vmatprep.mubr.bf16.mxu0 %v2520_v17 }
 0x199   : > { %1246 = vmatmul.mubr.bf16.gmra.mrb[4].mxu0 %v1649_v12 }
 0x19a   : > { %1255 = vmatprep.mubr.bf16.mxu0 %v2520_v17 }
 0x1a1   : > { %1256 = vmatmul.mubr.bf16.gmra.mrb[8].mxu0 %v1650_v19 }
 0x1a2   : > { %1265 = vmatprep.mubr.bf16.mxu0 %v2520_v17 }
 0x1a5   : > { %v1083_v8 = vpop.permute.xlu1 %1082 }
 0x1a7   : > { %v1078_v51 = vpop.permute.xlu0 %1077 }
 0x1a9   : > { %1266 = vmatmul.mubr.bf16.gmra.mrb[12].mxu0 %v1651_v30  ;;  %v1088_v45 = vpop.permute.xlu1 %1087 }
 0x1aa   : > { %1275 = vmatprep.mubr.bf16.mxu0 %v2520_v17 }
 0x1ab   : > { %v1093_v20 = vpop.permute.xlu0 %1092 }
 0x1ad   : > { %v1098_v7 = vpop.permute.xlu1 %1097 }
 0x1af   : > { %v1103_v14 = vpop.permute.xlu0 %1102 }
 0x1b1   : > { %1276 = vmatmul.mubr.bf16.gmra.mrb[16].mxu0 %v1652_v27  ;;  %v1108_v42 = vpop.permute.xlu1 %1107 }
 0x1b2   : > { %1285 = vmatprep.mubr.bf16.mxu0 %v2520_v17 }
 0x1b3   : > { %v1113_v4 = vpop.permute.xlu0 %1112 }
 0x1b9   : > { %1286 = vmatmul.mubr.bf16.gmra.mrb[20].mxu0 %v1653_v56 }
 0x1ba   : > { %1295 = vmatprep.mubr.bf16.mxu0 %v2520_v17 }
 0x1c1   : > { %1296 = vmatmul.mubr.bf16.gmra.mrb[24].mxu0 %v1654_v5 }
 0x1c2   : > { %1305 = vmatprep.mubr.bf16.mxu0 %v2520_v17 }
 0x1c9   : > { %1306 = vmatmul.mubr.bf16.gmra.mrb[28].mxu0 %v1655_v0  ;;  %v1118_v0 = vpop.permute.xlu1 %1117 }
 0x264   : > { %v1237_v18 = vpop.f32.mrb[0].mxu0 }
 0x265   : > { %v1238_v54 = vadd.f32 %v1237_v18, %v1078_v51  ;;  %v1239_v10 = vpop.f32.mrb[1].mxu0 }
 0x266   : > { %v1240_v21 = vadd.f32 %v1239_v10, %v1078_v51  ;;  %v1241_v6 = vpop.f32.mrb[2].mxu0 }
 0x267   : > { %v1242_v47 = vadd.f32 %v1241_v6, %v1083_v8  ;;  %v1243_v34 = vpop.f32.mrb[3].mxu0  ;;  %v1316_v43 = vmax.f32 %v1238_v54, 0.0 }
 0x268   : > { %v1244_v9 = vadd.f32 %v1243_v34, %v1083_v8  ;;  %v1317_v3 = vmax.f32 %v1240_v21, 0.0  ;;  %v1123_v8 = vpop.permute.xlu0 %1122 }
 0x269   : > { %v1318_v25 = vmax.f32 %v1242_v47, 0.0 }
 0x26a   : > { %v1319_v33 = vmax.f32 %v1244_v9, 0.0 }
 0x26b   : > { %v1349_v17 = vpack.c.bf16 %v1318_v25, %v1316_v43 }
 0x26c   : > { %v1247_v2 = vpop.f32.mrb[4].mxu0  ;;  %v1350_v50 = vpack.c.bf16 %v1319_v33, %v1317_v3 }
 0x26d   : > { %v1248_v37 = vadd.f32 %v1247_v2, %v1088_v45  ;;  %v1249_v55 = vpop.f32.mrb[5].mxu0 }
 0x26e   : > { %v1250_v31 = vadd.f32 %v1249_v55, %v1088_v45  ;;  %v1251_v39 = vpop.f32.mrb[6].mxu0  ;;  %1371 = vmatprep.subr.bf16.mxu1 %v1350_v50  ;;  %v1128_v45 = vpop.permute.xlu1 %1127 }
 0x26f   : > { %v1252_v63 = vadd.f32 %v1251_v39, %v1093_v20  ;;  %v1253_v60 = vpop.f32.mrb[7].mxu0  ;;  %1372 = vmatpush1.bf16.msra.mxu1 %v1349_v17  ;;  %v1320_v44 = vmax.f32 %v1248_v37, 0.0 }
 0x270   : > { %v1254_v35 = vadd.f32 %v1253_v60, %v1093_v20  ;;  %v1321_v57 = vmax.f32 %v1250_v31, 0.0  ;;  %v1133_v20 = vpop.permute.xlu0 %1132 }
 0x271   : > { %v1322_v1 = vmax.f32 %v1252_v63, 0.0 }
 0x272   : > { %v1323_v26 = vmax.f32 %v1254_v35, 0.0 }
 0x273   : > { %v1351_v48 = vpack.c.bf16 %v1322_v1, %v1320_v44 }
 0x274   : > { %v1352_v36 = vpack.c.bf16 %v1323_v26, %v1321_v57  ;;  %v1257_v40 = vpop.f32.mrb[8].mxu0 }
 0x275   : > { %v1258_v61 = vadd.f32 %v1257_v40, %v1098_v7  ;;  %v1259_v46 = vpop.f32.mrb[9].mxu0 }
 0x276   : > { %v1260_v24 = vadd.f32 %v1259_v46, %v1098_v7  ;;  %v1261_v28 = vpop.f32.mrb[10].mxu0  ;;  %1373 = vmatprep.subr.bf16.mxu1 %v1352_v36  ;;  %v1138_v7 = vpop.permute.xlu1 %1137 }
 0x277   : > { %v1262_v38 = vadd.f32 %v1261_v28, %v1103_v14  ;;  %v1263_v41 = vpop.f32.mrb[11].mxu0  ;;  %1374 = vmatpush1.bf16.msra.mxu1 %v1351_v48  ;;  %v1324_v11 = vmax.f32 %v1258_v61, 0.0 }
 0x278   : > { %v1264_v58 = vadd.f32 %v1263_v41, %v1103_v14  ;;  %v1325_v23 = vmax.f32 %v1260_v24, 0.0  ;;  %v1143_v14 = vpop.permute.xlu0 %1142 }
 0x279   : > { %v1326_v59 = vmax.f32 %v1262_v38, 0.0 }
 0x27a   : > { %v1327_v52 = vmax.f32 %v1264_v58, 0.0 }
 0x27b   : > { %v1353_v32 = vpack.c.bf16 %v1326_v59, %v1324_v11 }
 0x27c   : > { %v1354_v22 = vpack.c.bf16 %v1327_v52, %v1325_v23  ;;  %v1267_v53 = vpop.f32.mrb[12].mxu0 }
 0x27d   : > { %v1268_v62 = vadd.f32 %v1267_v53, %v1108_v42  ;;  %v1269_v16 = vpop.f32.mrb[13].mxu0 }
 0x27e   : > { %v1270_v29 = vadd.f32 %v1269_v16, %v1108_v42  ;;  %v1271_v15 = vpop.f32.mrb[14].mxu0  ;;  %1375 = vmatprep.subr.bf16.mxu1 %v1354_v22  ;;  %v1148_v42 = vpop.permute.xlu1 %1147 }
 0x27f   : > { %v1272_v13 = vadd.f32 %v1271_v15, %v1113_v4  ;;  %v1273_v49 = vpop.f32.mrb[15].mxu0  ;;  %1376 = vmatpush1.bf16.msra.mxu1 %v1353_v32  ;;  %v1328_v19 = vmax.f32 %v1268_v62, 0.0 }
 0x280   : > { %v1274_v12 = vadd.f32 %v1273_v49, %v1113_v4  ;;  %v1329_v27 = vmax.f32 %v1270_v29, 0.0  ;;  %v1153_v4 = vpop.permute.xlu0 %1152 }
 0x281   : > { %v1330_v30 = vmax.f32 %v1272_v13, 0.0 }
 0x282   : > { %v1331_v56 = vmax.f32 %v1274_v12, 0.0 }
 0x283   : > { %v1355_v5 = vpack.c.bf16 %v1330_v30, %v1328_v19 }
 0x284   : > { %v1356_v51 = vpack.c.bf16 %v1331_v56, %v1329_v27  ;;  %v1277_v18 = vpop.f32.mrb[16].mxu0 }
 0x285   : > { %v1278_v54 = vadd.f32 %v1277_v18, %v1118_v0  ;;  %v1279_v10 = vpop.f32.mrb[17].mxu0  ;;  %v1369_v18 = vpop.permute.xlu1 %1368 }
 0x286   : > { %v1280_v21 = vadd.f32 %v1279_v10, %v1118_v0  ;;  %v1281_v6 = vpop.f32.mrb[18].mxu0  ;;  %1377 = vmatprep.subr.bf16.mxu1 %v1356_v51  ;;  %v1348_v51 = vld [vmem:[%s2499_s5] sm:$0xf] }
 0x287   : > { %v1282_v47 = vadd.f32 %v1281_v6, %v1123_v8  ;;  %v1283_v34 = vpop.f32.mrb[19].mxu0  ;;  %1378 = vmatpush1.bf16.msra.mxu1 %v1355_v5  ;;  %v1332_v43 = vmax.f32 %v1278_v54, 0.0 }
 0x288   : > { %v1284_v9 = vadd.f32 %v1283_v34, %v1123_v8  ;;  %v1333_v3 = vmax.f32 %v1280_v21, 0.0 }
 0x289   : > { %v1334_v25 = vmax.f32 %v1282_v47, 0.0 }
 0x28a   : > { %v1335_v33 = vmax.f32 %v1284_v9, 0.0 }
 0x28b   : > { %v1357_v17 = vpack.c.bf16 %v1334_v25, %v1332_v43 }
 0x28c   : > { %v1358_v2 = vpack.c.bf16 %v1335_v33, %v1333_v3  ;;  %v1287_v50 = vpop.f32.mrb[20].mxu0 }
 0x28d   : > { %v1288_v37 = vadd.f32 %v1287_v50, %v1128_v45  ;;  %v1289_v55 = vpop.f32.mrb[21].mxu0 }
 0x28e   : > { %v1290_v31 = vadd.f32 %v1289_v55, %v1128_v45  ;;  %v1291_v39 = vpop.f32.mrb[22].mxu0  ;;  %1379 = vmatprep.subr.bf16.mxu1 %v1358_v2 }
 0x28f   : > { %v1292_v63 = vadd.f32 %v1291_v39, %v1133_v20  ;;  %v1293_v60 = vpop.f32.mrb[23].mxu0  ;;  %1380 = vmatpush1.bf16.msra.mxu1 %v1357_v17  ;;  %v1336_v44 = vmax.f32 %v1288_v37, 0.0 }
 0x290   : > { %v1294_v35 = vadd.f32 %v1293_v60, %v1133_v20  ;;  %v1337_v57 = vmax.f32 %v1290_v31, 0.0 }
 0x291   : > { %v1338_v1 = vmax.f32 %v1292_v63, 0.0 }
 0x292   : > { %v1339_v26 = vmax.f32 %v1294_v35, 0.0 }
 0x293   : > { %v1359_v48 = vpack.c.bf16 %v1338_v1, %v1336_v44 }
 0x294   : > { %v1360_v36 = vpack.c.bf16 %v1339_v26, %v1337_v57  ;;  %v1297_v40 = vpop.f32.mrb[24].mxu0 }
 0x295   : > { %v1298_v61 = vadd.f32 %v1297_v40, %v1138_v7  ;;  %v1299_v46 = vpop.f32.mrb[25].mxu0 }
 0x296   : > { %v1300_v24 = vadd.f32 %v1299_v46, %v1138_v7  ;;  %v1301_v28 = vpop.f32.mrb[26].mxu0  ;;  %1381 = vmatprep.subr.bf16.mxu1 %v1360_v36 }
 0x297   : > { %v1302_v38 = vadd.f32 %v1301_v28, %v1143_v14  ;;  %v1303_v41 = vpop.f32.mrb[27].mxu0  ;;  %1382 = vmatpush1.bf16.msra.mxu1 %v1359_v48  ;;  %v1340_v11 = vmax.f32 %v1298_v61, 0.0 }
 0x298   : > { %v1304_v58 = vadd.f32 %v1303_v41, %v1143_v14  ;;  %v1341_v23 = vmax.f32 %v1300_v24, 0.0 }
 0x299   : > { %v1342_v59 = vmax.f32 %v1302_v38, 0.0 }
 0x29a   : > { %v1343_v52 = vmax.f32 %v1304_v58, 0.0 }
 0x29b   : > { %v1361_v32 = vpack.c.bf16 %v1342_v59, %v1340_v11 }
 0x29c   : > { %v1362_v22 = vpack.c.bf16 %v1343_v52, %v1341_v23  ;;  %v1307_v53 = vpop.f32.mrb[28].mxu0 }
 0x29d   : > { %v1308_v62 = vadd.f32 %v1307_v53, %v1148_v42  ;;  %v1309_v16 = vpop.f32.mrb[29].mxu0 }
 0x29e   : > { %v1310_v29 = vadd.f32 %v1309_v16, %v1148_v42  ;;  %v1311_v15 = vpop.f32.mrb[30].mxu0  ;;  %1383 = vmatprep.subr.bf16.mxu1 %v1362_v22 }
 0x29f   : > { %v1312_v13 = vadd.f32 %v1311_v15, %v1153_v4  ;;  %v1313_v49 = vpop.f32.mrb[31].mxu0  ;;  %1384 = vmatpush1.bf16.msra.mxu1 %v1361_v32  ;;  %v1344_v19 = vmax.f32 %v1308_v62, 0.0 }
 0x2a0   : > { %v1314_v12 = vadd.f32 %v1313_v49, %v1153_v4  ;;  %v1345_v27 = vmax.f32 %v1310_v29, 0.0 }
 0x2a1   : > { %v1346_v30 = vmax.f32 %v1312_v13, 0.0 }
 0x2a2   : > { %v1347_v56 = vmax.f32 %v1314_v12, 0.0 }
 0x2a3   : > { %v1363_v5 = vpack.c.bf16 %v1346_v30, %v1344_v19 }
 0x2a4   : > { %v1364_v0 = vpack.c.bf16 %v1347_v56, %v1345_v27 }
 0x2a6   : > { %1385 = vmatprep.subr.bf16.mxu1 %v1364_v0 }
 0x2a7   : > { %1386 = vmatpush1.bf16.msra.mxu1 %v1363_v5 }
 0x2aa   : > { %1404 = vmatmul.mubr.bf16.vlgmr.msra.gmra.mrb[0].mxu1 %v1348_v51 }
 0x37d   : > { %v1405_v54 = vpop.f32.mrb[0].mxu1 }
 0x37e   : > { %v1406_v10 = vadd.f32 %v1405_v54, %v1369_v18  ;;  %v1407_v8 = vpop.f32.mrb[1].mxu1 }
 0x37f   : > { %v1408_v21 = vadd.f32 %v1407_v8, %v1369_v18  ;;  %v1409_v6 = vpop.f32.mrb[2].mxu1 }
 0x380   : > { %v1412_v47 = vrot.slane %v1406_v10, 4  ;;  %v1410_v34 = vpop.f32.mrb[3].mxu1 }
 0x381   : > { %v1418_v9 = vrot.slane %v1408_v21, 4 }
 0x382   : > { %v1413_v43 = vmax.f32 %v1406_v10, %v1412_v47 }
 0x383   : > { %v1419_v25 = vmax.f32 %v1408_v21, %v1418_v9 }
 0x384   : > { %v1414_v3 = vrot.slane %v1413_v43, 2 }
 0x385   : > { %v1420_v33 = vrot.slane %v1419_v25, 2 }
 0x386   : > { %v1415_v17 = vmax.f32 %v1413_v43, %v1414_v3 }
 0x387   : > { %v1421_v45 = vmax.f32 %v1419_v25, %v1420_v33 }
 0x388   : > { %v1416_v2 = vrot.slane %v1415_v17, 1 }
 0x389   : > { %v1422_v50 = vrot.slane %v1421_v45, 1 }
 0x38a   : > { %v1417_v37 = vmax.f32 %v1415_v17, %v1416_v2 }
 0x38b   : > { %v1423_v55 = vmax.f32 %v1421_v45, %v1422_v50 }
 0x38c   : > { %v1424_v20 = vsub.f32 %v1406_v10, %v1417_v37 }
 0x38d   : > { %v1425_v31 = vsub.f32 %v1408_v21, %v1423_v55 }
 0x38e   : > { %v1426_v39 = vmul.f32 1.442695, %v1424_v20 }
 0x38f   : > { %v1428_v63 = vmul.f32 1.442695, %v1425_v31 }
 0x390   : > { %1656 = vpow2.f32 %v1426_v39 }
 0x391   : > { %1658 = vpow2.f32 %v1428_v63 }
 0x39a   : > { %v1657_v60 = vpop.eup %1656 }
 0x39b   : > { %v1659_v35 = vpop.eup %1658  ;;  %v1430_v44 = vrot.slane %v1657_v60, 4 }
 0x39c   : > { %v1436_v1 = vrot.slane %v1659_v35, 4 }
 0x39d   : > { %v1431_v57 = vadd.f32 %v1657_v60, %v1430_v44 }
 0x39e   : > { %v1437_v26 = vadd.f32 %v1659_v35, %v1436_v1 }
 0x39f   : > { %v1432_v48 = vrot.slane %v1431_v57, 2 }
 0x3a0   : > { %v1438_v7 = vrot.slane %v1437_v26, 2 }
 0x3a1   : > { %v1433_v36 = vadd.f32 %v1432_v48, %v1431_v57 }
 0x3a2   : > { %v1439_v40 = vadd.f32 %v1438_v7, %v1437_v26 }
 0x3a3   : > { %v1434_v61 = vrot.slane %v1433_v36, 1 }
 0x3a4   : > { %v1440_v46 = vrot.slane %v1439_v40, 1 }
 0x3a5   : > { %v1435_v14 = vadd.f32 %v1434_v61, %v1433_v36 }
 0x3a6   : > { %v1441_v24 = vadd.f32 %v1440_v46, %v1439_v40 }
 0x3a7   : > { %1660 = vrcp.f32 %v1435_v14 }
 0x3a8   : > { %1662 = vrcp.f32 %v1441_v24 }
 0x3b1   : > { %v1661_v28 = vpop.eup %1660 }
 0x3b2   : > { %v1663_v38 = vpop.eup %1662  ;;  %v1444_v41 = vmul.f32 %v1661_v28, %v1435_v14 }
 0x3b3   : > { %v1445_v58 = vmul.f32 %v1663_v38, %v1441_v24 }
 0x3b4   : > { %v1446_v11 = vsub.f32 2.0, %v1444_v41 }
 0x3b5   : > { %v1447_v59 = vsub.f32 2.0, %v1445_v58 }
 0x3b6   : > { %v1448_v23 = vmul.f32 %v1661_v28, %v1446_v11 }
 0x3b7   : > { %v1449_v52 = vmul.f32 %v1663_v38, %v1447_v59 }
 0x3b8   : > { %v1450_v32 = vmul.f32 %v1657_v60, %v1448_v23 }
 0x3b9   : > { %v1451_v42 = vmul.f32 %v1659_v35, %v1449_v52 }
 0x3bb   : > { %v1454_v22 = vcombine.low %v1450_v32, %v1451_v42 }
 0x3bd   : > { %1553 = vst.sshfl [vmem:[%s272_s8] sm:$0x33 pattern:$0x76325410] %v1454_v22 }
 0x3be   : > { %1677 = shalt.err (!%p1674_p3)
}
 0x3bf   : > { %s1678_s20 = scalar_lea.hbm %s2452_s15, 64  ;;  %s1682_s23 = scalar_lea.hbm %s2501_s7, 128 }
 0x3c0   : > { %p1679_p4 = scmp.ne.s32.totalorder %s2452_s15, %s1678_s20  ;;  %p1683_p9 = scmp.lt.u32.totalorder %s2452_s15, %s2501_s7 }
 0x3c1   : > { %p1684_p10 = scmp.lt.u32.totalorder %s1682_s23, %s1678_s20  ;;  %p1686_p12 = scmp.lt.u32.totalorder %s1678_s20, %s2452_s15 }
 0x3c2   : > { %p1680_p7 = pnand %p1679_p4, %p1811_p5 }
 0x3c3   : > { %p1685_p11 = por %p1684_p10, %p1683_p9 }
 0x3c4   : > { %p1681_p8 = pneg %p1680_p7 }
 0x3c5   : > { %p1687_p13 = por %p1686_p12, %p1685_p11 }
 0x3c7   : > { %p1688_p0 = pnand %p1687_p13, %p1681_p8 }
 0x3c9   : > { %1691 = shalt.err (!%p1688_p0)
}
 0x3ca   : > { %1560 = dma.vmem_to_hbm [thread:$0]  (%p1811_p5), %s2454_s9, 64, %s2452_s15, %s1465_s16  }
 0x3cb PF: > { %p1566_p1 = scmp.ge.s32.totalorder %s1726_s27, 2  ;;  %s1491_s13 = sand.u32 1, %s1714_s24  }
 0x3cc   : > { %s1492_s14 = scalar_lea.sflag [#allocation3], %s1491_s13 }
 0x3cd   : > { %p1563_p2 = pnand %p1566_p1, %p1815_p6 }
 0x3cf   : > { %1709 = dma.done.wait (!%p1563_p2), %s1492_s14, 64  }
 0x3d0   : > { %1711 = vsyncadd (!%p1563_p2), %s1492_s14, 4294967232  ;;  %p17_p3 = scmp.ge.s32.totalorder %s1798_s30, 4   ;;  %s2527_s24 = smov %s1718_s25 }
 0x3d1   : > { %s2528_s25 = smov %s1722_s26  ;;  %s2529_s26 = smov %s1809_s10 }
 0x3d2   : > { %s2530_s27 = smov %s1798_s30  ;;  %19 = sbr.rel (!%p17_p3) target bundleno = 3 (0x3), region = 83 }
 0x3d9   :  { %1497 = vsyncpa [#allocation3], 1 }
 0x3da   :  { %1499 = vsyncpa [#allocation3 + $0x1], 1 }

</bundles_post_ra>
